<compile_context>
chip_gen: v7x
topology: tpu7x:2x2x1
jax: 0.10.0
libtpu: 0.0.40
codegen_flags: <defaults>
</compile_context>

<pallas_src>
import math

import numpy as np
import jax
import jax.numpy as jnp
from jax import lax
from jax.experimental import pallas as pl
from jax.experimental.pallas import tpu as pltpu


def _vmem_cap_bytes():
    """Device-aware scoped-VMEM cap (v5e/v6e: 128 MiB/TC, v7x: 64 MiB/TC)."""
    try:
        info = pltpu.get_tpu_info()
        return int(0.75 * info.vmem_capacity_bytes)
    except Exception:
        # Off-TPU / interpret-mode fallback: conservative value that fits every generation.
        return 48 * 1024 * 1024


def make_resblock_kernel(C, HWp, Nb, shifts, use_patch):
    """shifts: 8 static flat-lane shifts for the non-center 3x3 taps (k order, skipping k=4)."""
    L = Nb * HWp
    f32 = jnp.float32

    def kernel(x_ref, mask_ref, w1_ref, b1_ref, w2_ref, b2_ref, w3_ref, b3_ref, out_ref):
        # x_ref:   (Nb, C, HWp)  Nb images; channels on sublanes, pixels on lanes
        # mask_ref:(8, L)        0/1 validity masks for the 8 non-center taps
        # w1/w2:   (C, 9C) [use_patch] or (9, C, C) [per-tap], w3: (C, C) [co, ci]
        # b*:      (C, 1)
        # out_ref: (Nb, C, HWp)
        if Nb == 1:
            xt = x_ref[0].astype(f32)                                   # (C, L)
        else:
            # Lane-concat the Nb images -> one wide matmul per conv over all of them.
            xt = jnp.concatenate([x_ref[i].astype(f32) for i in range(Nb)], axis=1)

        # Hoist the 8 (1,L)->(C,L) mask broadcasts; each is reused by both 3x3 convs.
        maskb = [jnp.broadcast_to(mask_ref[pl.ds(m, 1), :].astype(f32), (C, L))
                 for m in range(8)]

        def shift_lanes(a, s):
            # result[:, p] = a[:, (p + s) % L]; wrapped lanes are zeroed by the tap masks.
            if s == 0:
                return a
            t = s % L
            return jnp.concatenate([a[:, t:], a[:, :t]], axis=1)

        def taps_of(a):
            # 9 masked taps in k = kh*3+kw order; the center tap needs no shift/mask.
            out = []
            m = 0
            for k in range(9):
                if k == 4:
                    out.append(a)
                else:
                    out.append(shift_lanes(a, shifts[m]) * maskb[m])
                    m += 1
            return out

        if use_patch:
            def conv3x3(a, w_ref, b_ref):
                # im2col: stack the 9 taps on sublanes -> one (C,9C)@(9C,L) MXU matmul.
                patches = jnp.concatenate(taps_of(a), axis=0)           # (9C, L)
                return (jnp.dot(w_ref[...].astype(f32), patches,
                                preferred_element_type=f32)
                        + b_ref[...].astype(f32))
        else:
            def conv3x3(a, w_ref, b_ref):
                # Accumulate-per-tap: no (9C, L) patch materialisation / store traffic.
                taps = taps_of(a)
                acc = (jnp.dot(w_ref[4].astype(f32), taps[4],
                               preferred_element_type=f32)
                       + b_ref[...].astype(f32))
                for k in range(9):
                    if k == 4:
                        continue
                    acc = acc + jnp.dot(w_ref[k].astype(f32), taps[k],
                                        preferred_element_type=f32)
                return acc

        h1 = jnp.maximum(conv3x3(xt, w1_ref, b1_ref), 0.0)
        h2 = jnp.maximum(conv3x3(h1, w2_ref, b2_ref), 0.0)
        h3 = (jnp.dot(w3_ref[...].astype(f32), h2, preferred_element_type=f32)
              + b3_ref[...].astype(f32))
        res = h3 + xt                                                   # residual add
        for i in range(Nb):
            out_ref[i] = res[:, i * HWp:(i + 1) * HWp].astype(out_ref.dtype)

    return kernel


def resblock_pallas(x_nchw, w1, b1, w2, b2, w3, b3):
    """x_nchw: (N, C, H, W). w1, w2: (3, 3, Ci, Co) HWIO. w3: (C, C) [ci, co]. b*: (C,)."""
    N, C, H, W = x_nchw.shape
    HW = H * W
    HWp = ((HW + 127) // 128) * 128          # lane-dense spatial extent
    itemsize = np.dtype(x_nchw.dtype).itemsize

    cap = _vmem_cap_bytes()

    def working_set(nb, patch):
        L = nb * HWp
        act = 4 * C * L                                   # one f32 activation plane
        io = 4 * nb * C * HWp * itemsize                  # in + out blocks, double-buffered
        wgt = 8 * (2 * 9 * C * C + C * C + 3 * C) + 8 * 8 * L  # weights/biases/masks (x2 bufs)
        tmp = act * (13 + (9 if patch else 1))            # xt,h1,h2,h3,res + masks + patch/acc
        return io + wgt + tmp

    use_patch = C >= 64                                   # single K=9C matmul only for wide C
    nb = 1
    for d in range(min(N, 8), 0, -1):                     # largest divisor of N fitting VMEM
        if N % d == 0 and working_set(d, use_patch) <= 0.7 * cap:
            nb = d
            break
    if use_patch and working_set(nb, True) > 0.7 * cap:   # patch too big -> per-tap variant
        use_patch = False
    vmem_limit = int(min(max(2 * working_set(nb, use_patch), 16 * 2 ** 20), cap))

    L = nb * HWp

    # Static per-tap flat-lane shifts and 0/1 validity masks (non-center taps only),
    # built over the padded per-image extent and tiled across the nb lane-concatenated
    # images.  Passed as a kernel INPUT (previously closure-captured -> compile error).
    hh = np.repeat(np.arange(H), W)
    ww = np.tile(np.arange(W), H)
    shifts, rows = [], []
    for k in range(9):
        if k == 4:
            continue
        dh, dw = k // 3 - 1, k % 3 - 1
        shifts.append(dh * W + dw)
        valid = ((hh + dh >= 0) & (hh + dh < H) &
                 (ww + dw >= 0) & (ww + dw < W)).astype(np.float32)     # (HW,)
        valid = np.pad(valid, (0, HWp - HW))
        rows.append(np.tile(valid, nb))
    mask_arr = jnp.asarray(np.stack(rows, axis=0))                      # (8, L) f32

    x2 = x_nchw.reshape(N, C, HW)
    if HWp != HW:
        x2 = jnp.pad(x2, ((0, 0), (0, 0), (0, HWp - HW)))               # lane-dense padding

    if use_patch:
        # (3,3,Ci,Co) HWIO -> (Co, 9*Ci), column index (kh*3+kw)*C + ci
        w1m = jnp.transpose(w1, (3, 0, 1, 2)).reshape(C, 9 * C)
        w2m = jnp.transpose(w2, (3, 0, 1, 2)).reshape(C, 9 * C)
        w_spec = pl.BlockSpec((C, 9 * C), lambda b: (0, 0))
    else:
        # (3,3,Ci,Co) -> (9, Co, Ci): one clean (C, C) tile per tap
        w1m = jnp.transpose(w1, (0, 1, 3, 2)).reshape(9, C, C)
        w2m = jnp.transpose(w2, (0, 1, 3, 2)).reshape(9, C, C)
        w_spec = pl.BlockSpec((9, C, C), lambda b: (0, 0, 0))
    w3m = jnp.transpose(w3, (1, 0))                                     # (Co, Ci)
    b1r, b2r, b3r = b1.reshape(C, 1), b2.reshape(C, 1), b3.reshape(C, 1)
    bias_spec = pl.BlockSpec((C, 1), lambda b: (0, 0))

    out = pl.pallas_call(
        make_resblock_kernel(C, HWp, nb, tuple(shifts), use_patch),
        out_shape=jax.ShapeDtypeStruct((N, C, HWp), x_nchw.dtype),
        grid_spec=pltpu.PrefetchScalarGridSpec(
            num_scalar_prefetch=0,
            grid=(N // nb,),                 # nb images per grid step
            in_specs=[
                pl.BlockSpec((nb, C, HWp), lambda b: (b, 0, 0)),
                pl.BlockSpec((8, L), lambda b: (0, 0)),
                w_spec, bias_spec,
                w_spec, bias_spec,
                pl.BlockSpec((C, C), lambda b: (0, 0)), bias_spec,
            ],
            out_specs=pl.BlockSpec((nb, C, HWp), lambda b: (b, 0, 0)),
        ),
        compiler_params=pltpu.CompilerParams(
            dimension_semantics=("parallel",),
            vmem_limit_bytes=vmem_limit,
        ),
    )(x2, mask_arr, w1m, b1r, w2m, b2r, w3m, b3r)

    if HWp != HW:
        out = out[:, :, :HW]
    return out.reshape(N, C, H, W)


def resblock_ref(x_nchw, w1, b1, w2, b2, w3, b3):
    """Pure-JAX reference matching the PyTorch ResBlock forward (NCHW)."""
    C = x_nchw.shape[1]
    dn = ('NCHW', 'HWIO', 'NCHW')
    bshape = (1, C, 1, 1)
    y = lax.conv_general_dilated(x_nchw, w1, (1, 1), 'SAME',
                                 dimension_numbers=dn) + b1.reshape(bshape)
    y = jnp.maximum(y, 0.0)
    y = lax.conv_general_dilated(y, w2, (1, 1), 'SAME',
                                 dimension_numbers=dn) + b2.reshape(bshape)
    y = jnp.maximum(y, 0.0)
    y = lax.conv_general_dilated(y, w3.reshape(1, 1, C, C), (1, 1), 'SAME',
                                 dimension_numbers=dn) + b3.reshape(bshape)
    return y + x_nchw


def _run_case(key, N, C, H, W):
    ks = jax.random.split(key, 7)
    x = jax.random.normal(ks[0], (N, C, H, W), jnp.float32)
    bound3 = 1.0 / math.sqrt(C * 9)   # fan_in of 3x3 conv
    bound1 = 1.0 / math.sqrt(C)       # fan_in of 1x1 conv
    w1 = jax.random.uniform(ks[1], (3, 3, C, C), jnp.float32, -bound3, bound3)
    b1 = jax.random.uniform(ks[2], (C,), jnp.float32, -bound3, bound3)
    w2 = jax.random.uniform(ks[3], (3, 3, C, C), jnp.float32, -bound3, bound3)
    b2 = jax.random.uniform(ks[4], (C,), jnp.float32, -bound3, bound3)
    w3 = jax.random.uniform(ks[5], (C, C), jnp.float32, -bound1, bound1)
    b3 = jax.random.uniform(ks[6], (C,), jnp.float32, -bound1, bound1)

    y = jax.block_until_ready(resblock_pallas(x, w1, b1, w2, b2, w3, b3))
    y_ref = resblock_ref(x, w1, b1, w2, b2, w3, b3)
    err = float(jnp.max(jnp.abs(y - y_ref)))
    assert jnp.allclose(y, y_ref, rtol=1e-4, atol=1e-4), \
        f"max abs err = {err} at (N,C,H,W)=({N},{C},{H},{W})"


if __name__ == "__main__":
    key = jax.random.PRNGKey(0)
    k1, k2 = jax.random.split(key)
    # Small-C shape: per-tap accumulate path, 2 images lane-concatenated per grid step.
    _run_case(k1, 2, 8, 16, 16)
    # Wider-C shape: single K=9C im2col matmul path + lane padding (HW=64 -> 128 lanes).
    _run_case(k2, 2, 64, 8, 8)
    print("KERNEL_OK")
</pallas_src>

<mosaic_0001>
module attributes {stable_mosaic.version = 11 : i64} {
  func.func @kernel(%arg0: i32, %arg1: memref<2x8x256xf32, #tpu.memory_space<vmem>>, %arg2: memref<8x512xf32, #tpu.memory_space<vmem>>, %arg3: memref<9x8x8xf32, #tpu.memory_space<vmem>>, %arg4: memref<8x1xf32, #tpu.memory_space<vmem>>, %arg5: memref<9x8x8xf32, #tpu.memory_space<vmem>>, %arg6: memref<8x1xf32, #tpu.memory_space<vmem>>, %arg7: memref<8x8xf32, #tpu.memory_space<vmem>>, %arg8: memref<8x1xf32, #tpu.memory_space<vmem>>, %arg9: memref<2x8x256xf32, #tpu.memory_space<vmem>>) attributes {dimension_semantics = [#tpu.dimension_semantics<parallel>], iteration_bounds = array<i64: 1>, scalar_prefetch = 0 : i64, scratch_operands = 0 : i64, tpu.core_type = #tpu.core_type<tc>, window_params = [{transform_indices = @transform_0, window_bounds = array<i64: 2, 8, 256>}, {pipeline_mode = #tpu.pipeline_mode<synchronous>, transform_indices = @transform_1, window_bounds = array<i64: 8, 512>}, {pipeline_mode = #tpu.pipeline_mode<synchronous>, transform_indices = @transform_2, window_bounds = array<i64: 9, 8, 8>}, {pipeline_mode = #tpu.pipeline_mode<synchronous>, transform_indices = @transform_3, window_bounds = array<i64: 8, 1>}, {pipeline_mode = #tpu.pipeline_mode<synchronous>, transform_indices = @transform_4, window_bounds = array<i64: 9, 8, 8>}, {pipeline_mode = #tpu.pipeline_mode<synchronous>, transform_indices = @transform_5, window_bounds = array<i64: 8, 1>}, {pipeline_mode = #tpu.pipeline_mode<synchronous>, transform_indices = @transform_6, window_bounds = array<i64: 8, 8>}, {pipeline_mode = #tpu.pipeline_mode<synchronous>, transform_indices = @transform_7, window_bounds = array<i64: 8, 1>}, {transform_indices = @transform_8, window_bounds = array<i64: 2, 8, 256>}]} {
    %c0 = arith.constant 0 : index
    %c0_0 = arith.constant 0 : index
    %c0_1 = arith.constant 0 : index
    %0 = vector.load %arg1[%c0, %c0_0, %c0_1] : memref<2x8x256xf32, #tpu.memory_space<vmem>>, vector<1x8x256xf32>
    %1 = vector.shape_cast %0 : vector<1x8x256xf32> to vector<8x256xf32>
    %c1 = arith.constant 1 : index
    %c0_2 = arith.constant 0 : index
    %c0_3 = arith.constant 0 : index
    %2 = vector.load %arg1[%c1, %c0_2, %c0_3] : memref<2x8x256xf32, #tpu.memory_space<vmem>>, vector<1x8x256xf32>
    %3 = vector.shape_cast %2 : vector<1x8x256xf32> to vector<8x256xf32>
    %4 = tpu.concatenate %1, %3 in 1 : vector<8x256xf32>, vector<8x256xf32> -> vector<8x512xf32>
    %c0_4 = arith.constant 0 : index
    %c0_5 = arith.constant 0 : index
    %5 = vector.load %arg2[%c0_4, %c0_5] : memref<8x512xf32, #tpu.memory_space<vmem>>, vector<1x512xf32>
    %6 = vector.shape_cast %5 : vector<1x512xf32> to vector<1x512xf32>
    %7 = vector.broadcast %6 : vector<1x512xf32> to vector<8x512xf32>
    %c1_6 = arith.constant 1 : index
    %c0_7 = arith.constant 0 : index
    %8 = vector.load %arg2[%c1_6, %c0_7] : memref<8x512xf32, #tpu.memory_space<vmem>>, vector<1x512xf32>
    %9 = vector.shape_cast %8 : vector<1x512xf32> to vector<1x512xf32>
    %10 = vector.broadcast %9 : vector<1x512xf32> to vector<8x512xf32>
    %c2 = arith.constant 2 : index
    %c0_8 = arith.constant 0 : index
    %11 = vector.load %arg2[%c2, %c0_8] : memref<8x512xf32, #tpu.memory_space<vmem>>, vector<1x512xf32>
    %12 = vector.shape_cast %11 : vector<1x512xf32> to vector<1x512xf32>
    %13 = vector.broadcast %12 : vector<1x512xf32> to vector<8x512xf32>
    %c3 = arith.constant 3 : index
    %c0_9 = arith.constant 0 : index
    %14 = vector.load %arg2[%c3, %c0_9] : memref<8x512xf32, #tpu.memory_space<vmem>>, vector<1x512xf32>
    %15 = vector.shape_cast %14 : vector<1x512xf32> to vector<1x512xf32>
    %16 = vector.broadcast %15 : vector<1x512xf32> to vector<8x512xf32>
    %c4 = arith.constant 4 : index
    %c0_10 = arith.constant 0 : index
    %17 = vector.load %arg2[%c4, %c0_10] : memref<8x512xf32, #tpu.memory_space<vmem>>, vector<1x512xf32>
    %18 = vector.shape_cast %17 : vector<1x512xf32> to vector<1x512xf32>
    %19 = vector.broadcast %18 : vector<1x512xf32> to vector<8x512xf32>
    %c5 = arith.constant 5 : index
    %c0_11 = arith.constant 0 : index
    %20 = vector.load %arg2[%c5, %c0_11] : memref<8x512xf32, #tpu.memory_space<vmem>>, vector<1x512xf32>
    %21 = vector.shape_cast %20 : vector<1x512xf32> to vector<1x512xf32>
    %22 = vector.broadcast %21 : vector<1x512xf32> to vector<8x512xf32>
    %c6 = arith.constant 6 : index
    %c0_12 = arith.constant 0 : index
    %23 = vector.load %arg2[%c6, %c0_12] : memref<8x512xf32, #tpu.memory_space<vmem>>, vector<1x512xf32>
    %24 = vector.shape_cast %23 : vector<1x512xf32> to vector<1x512xf32>
    %25 = vector.broadcast %24 : vector<1x512xf32> to vector<8x512xf32>
    %c7 = arith.constant 7 : index
    %c0_13 = arith.constant 0 : index
    %26 = vector.load %arg2[%c7, %c0_13] : memref<8x512xf32, #tpu.memory_space<vmem>>, vector<1x512xf32>
    %27 = vector.shape_cast %26 : vector<1x512xf32> to vector<1x512xf32>
    %28 = vector.broadcast %27 : vector<1x512xf32> to vector<8x512xf32>
    %29 = vector.extract_strided_slice %4 {offsets = [0, 495], sizes = [8, 17], strides = [1, 1]} : vector<8x512xf32> to vector<8x17xf32>
    %30 = vector.extract_strided_slice %4 {offsets = [0, 0], sizes = [8, 495], strides = [1, 1]} : vector<8x512xf32> to vector<8x495xf32>
    %31 = tpu.concatenate %29, %30 in 1 : vector<8x17xf32>, vector<8x495xf32> -> vector<8x512xf32>
    %32 = arith.mulf %31, %7 : vector<8x512xf32>
    %33 = vector.extract_strided_slice %4 {offsets = [0, 496], sizes = [8, 16], strides = [1, 1]} : vector<8x512xf32> to vector<8x16xf32>
    %34 = vector.extract_strided_slice %4 {offsets = [0, 0], sizes = [8, 496], strides = [1, 1]} : vector<8x512xf32> to vector<8x496xf32>
    %35 = tpu.concatenate %33, %34 in 1 : vector<8x16xf32>, vector<8x496xf32> -> vector<8x512xf32>
    %36 = arith.mulf %35, %10 : vector<8x512xf32>
    %37 = vector.extract_strided_slice %4 {offsets = [0, 497], sizes = [8, 15], strides = [1, 1]} : vector<8x512xf32> to vector<8x15xf32>
    %38 = vector.extract_strided_slice %4 {offsets = [0, 0], sizes = [8, 497], strides = [1, 1]} : vector<8x512xf32> to vector<8x497xf32>
    %39 = tpu.concatenate %37, %38 in 1 : vector<8x15xf32>, vector<8x497xf32> -> vector<8x512xf32>
    %40 = arith.mulf %39, %13 : vector<8x512xf32>
    %41 = vector.extract_strided_slice %4 {offsets = [0, 511], sizes = [8, 1], strides = [1, 1]} : vector<8x512xf32> to vector<8x1xf32>
    %42 = vector.extract_strided_slice %4 {offsets = [0, 0], sizes = [8, 511], strides = [1, 1]} : vector<8x512xf32> to vector<8x511xf32>
    %43 = tpu.concatenate %41, %42 in 1 : vector<8x1xf32>, vector<8x511xf32> -> vector<8x512xf32>
    %44 = arith.mulf %43, %16 : vector<8x512xf32>
    %45 = vector.extract_strided_slice %4 {offsets = [0, 1], sizes = [8, 511], strides = [1, 1]} : vector<8x512xf32> to vector<8x511xf32>
    %46 = vector.extract_strided_slice %4 {offsets = [0, 0], sizes = [8, 1], strides = [1, 1]} : vector<8x512xf32> to vector<8x1xf32>
    %47 = tpu.concatenate %45, %46 in 1 : vector<8x511xf32>, vector<8x1xf32> -> vector<8x512xf32>
    %48 = arith.mulf %47, %19 : vector<8x512xf32>
    %49 = vector.extract_strided_slice %4 {offsets = [0, 15], sizes = [8, 497], strides = [1, 1]} : vector<8x512xf32> to vector<8x497xf32>
    %50 = vector.extract_strided_slice %4 {offsets = [0, 0], sizes = [8, 15], strides = [1, 1]} : vector<8x512xf32> to vector<8x15xf32>
    %51 = tpu.concatenate %49, %50 in 1 : vector<8x497xf32>, vector<8x15xf32> -> vector<8x512xf32>
    %52 = arith.mulf %51, %22 : vector<8x512xf32>
    %53 = vector.extract_strided_slice %4 {offsets = [0, 16], sizes = [8, 496], strides = [1, 1]} : vector<8x512xf32> to vector<8x496xf32>
    %54 = vector.extract_strided_slice %4 {offsets = [0, 0], sizes = [8, 16], strides = [1, 1]} : vector<8x512xf32> to vector<8x16xf32>
    %55 = tpu.concatenate %53, %54 in 1 : vector<8x496xf32>, vector<8x16xf32> -> vector<8x512xf32>
    %56 = arith.mulf %55, %25 : vector<8x512xf32>
    %57 = vector.extract_strided_slice %4 {offsets = [0, 17], sizes = [8, 495], strides = [1, 1]} : vector<8x512xf32> to vector<8x495xf32>
    %58 = vector.extract_strided_slice %4 {offsets = [0, 0], sizes = [8, 17], strides = [1, 1]} : vector<8x512xf32> to vector<8x17xf32>
    %59 = tpu.concatenate %57, %58 in 1 : vector<8x495xf32>, vector<8x17xf32> -> vector<8x512xf32>
    %60 = arith.mulf %59, %28 : vector<8x512xf32>
    %c4_14 = arith.constant 4 : index
    %c0_15 = arith.constant 0 : index
    %c0_16 = arith.constant 0 : index
    %61 = vector.load %arg3[%c4_14, %c0_15, %c0_16] : memref<9x8x8xf32, #tpu.memory_space<vmem>>, vector<1x8x8xf32>
    %62 = vector.shape_cast %61 : vector<1x8x8xf32> to vector<8x8xf32>
    %cst = arith.constant dense<0.000000e+00> : vector<8x512xf32>
    %63 = tpu.matmul %62, %4, %cst {dimension_numbers = #tpu.dot_dimension_numbers<[1], [0], [0], [1], [0, 0, 1, 1], [], []>} : vector<8x8xf32>, vector<8x512xf32>, vector<8x512xf32> -> vector<8x512xf32>
    %c0_17 = arith.constant 0 : index
    %c0_18 = arith.constant 0 : index
    %64 = vector.load %arg4[%c0_17, %c0_18] : memref<8x1xf32, #tpu.memory_space<vmem>>, vector<8x1xf32>
    %65 = vector.broadcast %64 : vector<8x1xf32> to vector<8x512xf32>
    %66 = arith.addf %63, %65 : vector<8x512xf32>
    %c0_19 = arith.constant 0 : index
    %c0_20 = arith.constant 0 : index
    %c0_21 = arith.constant 0 : index
    %67 = vector.load %arg3[%c0_19, %c0_20, %c0_21] : memref<9x8x8xf32, #tpu.memory_space<vmem>>, vector<1x8x8xf32>
    %68 = vector.shape_cast %67 : vector<1x8x8xf32> to vector<8x8xf32>
    %cst_22 = arith.constant dense<0.000000e+00> : vector<8x512xf32>
    %69 = tpu.matmul %68, %32, %cst_22 {dimension_numbers = #tpu.dot_dimension_numbers<[1], [0], [0], [1], [0, 0, 1, 1], [], []>} : vector<8x8xf32>, vector<8x512xf32>, vector<8x512xf32> -> vector<8x512xf32>
    %70 = arith.addf %66, %69 : vector<8x512xf32>
    %c1_23 = arith.constant 1 : index
    %c0_24 = arith.constant 0 : index
    %c0_25 = arith.constant 0 : index
    %71 = vector.load %arg3[%c1_23, %c0_24, %c0_25] : memref<9x8x8xf32, #tpu.memory_space<vmem>>, vector<1x8x8xf32>
    %72 = vector.shape_cast %71 : vector<1x8x8xf32> to vector<8x8xf32>
    %cst_26 = arith.constant dense<0.000000e+00> : vector<8x512xf32>
    %73 = tpu.matmul %72, %36, %cst_26 {dimension_numbers = #tpu.dot_dimension_numbers<[1], [0], [0], [1], [0, 0, 1, 1], [], []>} : vector<8x8xf32>, vector<8x512xf32>, vector<8x512xf32> -> vector<8x512xf32>
    %74 = arith.addf %70, %73 : vector<8x512xf32>
    %c2_27 = arith.constant 2 : index
    %c0_28 = arith.constant 0 : index
    %c0_29 = arith.constant 0 : index
    %75 = vector.load %arg3[%c2_27, %c0_28, %c0_29] : memref<9x8x8xf32, #tpu.memory_space<vmem>>, vector<1x8x8xf32>
    %76 = vector.shape_cast %75 : vector<1x8x8xf32> to vector<8x8xf32>
    %cst_30 = arith.constant dense<0.000000e+00> : vector<8x512xf32>
    %77 = tpu.matmul %76, %40, %cst_30 {dimension_numbers = #tpu.dot_dimension_numbers<[1], [0], [0], [1], [0, 0, 1, 1], [], []>} : vector<8x8xf32>, vector<8x512xf32>, vector<8x512xf32> -> vector<8x512xf32>
    %78 = arith.addf %74, %77 : vector<8x512xf32>
    %c3_31 = arith.constant 3 : index
    %c0_32 = arith.constant 0 : index
    %c0_33 = arith.constant 0 : index
    %79 = vector.load %arg3[%c3_31, %c0_32, %c0_33] : memref<9x8x8xf32, #tpu.memory_space<vmem>>, vector<1x8x8xf32>
    %80 = vector.shape_cast %79 : vector<1x8x8xf32> to vector<8x8xf32>
    %cst_34 = arith.constant dense<0.000000e+00> : vector<8x512xf32>
    %81 = tpu.matmul %80, %44, %cst_34 {dimension_numbers = #tpu.dot_dimension_numbers<[1], [0], [0], [1], [0, 0, 1, 1], [], []>} : vector<8x8xf32>, vector<8x512xf32>, vector<8x512xf32> -> vector<8x512xf32>
    %82 = arith.addf %78, %81 : vector<8x512xf32>
    %c5_35 = arith.constant 5 : index
    %c0_36 = arith.constant 0 : index
    %c0_37 = arith.constant 0 : index
    %83 = vector.load %arg3[%c5_35, %c0_36, %c0_37] : memref<9x8x8xf32, #tpu.memory_space<vmem>>, vector<1x8x8xf32>
    %84 = vector.shape_cast %83 : vector<1x8x8xf32> to vector<8x8xf32>
    %cst_38 = arith.constant dense<0.000000e+00> : vector<8x512xf32>
    %85 = tpu.matmul %84, %48, %cst_38 {dimension_numbers = #tpu.dot_dimension_numbers<[1], [0], [0], [1], [0, 0, 1, 1], [], []>} : vector<8x8xf32>, vector<8x512xf32>, vector<8x512xf32> -> vector<8x512xf32>
    %86 = arith.addf %82, %85 : vector<8x512xf32>
    %c6_39 = arith.constant 6 : index
    %c0_40 = arith.constant 0 : index
    %c0_41 = arith.constant 0 : index
    %87 = vector.load %arg3[%c6_39, %c0_40, %c0_41] : memref<9x8x8xf32, #tpu.memory_space<vmem>>, vector<1x8x8xf32>
    %88 = vector.shape_cast %87 : vector<1x8x8xf32> to vector<8x8xf32>
    %cst_42 = arith.constant dense<0.000000e+00> : vector<8x512xf32>
    %89 = tpu.matmul %88, %52, %cst_42 {dimension_numbers = #tpu.dot_dimension_numbers<[1], [0], [0], [1], [0, 0, 1, 1], [], []>} : vector<8x8xf32>, vector<8x512xf32>, vector<8x512xf32> -> vector<8x512xf32>
    %90 = arith.addf %86, %89 : vector<8x512xf32>
    %c7_43 = arith.constant 7 : index
    %c0_44 = arith.constant 0 : index
    %c0_45 = arith.constant 0 : index
    %91 = vector.load %arg3[%c7_43, %c0_44, %c0_45] : memref<9x8x8xf32, #tpu.memory_space<vmem>>, vector<1x8x8xf32>
    %92 = vector.shape_cast %91 : vector<1x8x8xf32> to vector<8x8xf32>
    %cst_46 = arith.constant dense<0.000000e+00> : vector<8x512xf32>
    %93 = tpu.matmul %92, %56, %cst_46 {dimension_numbers = #tpu.dot_dimension_numbers<[1], [0], [0], [1], [0, 0, 1, 1], [], []>} : vector<8x8xf32>, vector<8x512xf32>, vector<8x512xf32> -> vector<8x512xf32>
    %94 = arith.addf %90, %93 : vector<8x512xf32>
    %c8 = arith.constant 8 : index
    %c0_47 = arith.constant 0 : index
    %c0_48 = arith.constant 0 : index
    %95 = vector.load %arg3[%c8, %c0_47, %c0_48] : memref<9x8x8xf32, #tpu.memory_space<vmem>>, vector<1x8x8xf32>
    %96 = vector.shape_cast %95 : vector<1x8x8xf32> to vector<8x8xf32>
    %cst_49 = arith.constant dense<0.000000e+00> : vector<8x512xf32>
    %97 = tpu.matmul %96, %60, %cst_49 {dimension_numbers = #tpu.dot_dimension_numbers<[1], [0], [0], [1], [0, 0, 1, 1], [], []>} : vector<8x8xf32>, vector<8x512xf32>, vector<8x512xf32> -> vector<8x512xf32>
    %98 = arith.addf %94, %97 : vector<8x512xf32>
    %cst_50 = arith.constant 0.000000e+00 : f32
    %99 = vector.broadcast %cst_50 : f32 to vector<8x512xf32>
    %100 = arith.maximumf %98, %99 : vector<8x512xf32>
    %101 = vector.extract_strided_slice %100 {offsets = [0, 495], sizes = [8, 17], strides = [1, 1]} : vector<8x512xf32> to vector<8x17xf32>
    %102 = vector.extract_strided_slice %100 {offsets = [0, 0], sizes = [8, 495], strides = [1, 1]} : vector<8x512xf32> to vector<8x495xf32>
    %103 = tpu.concatenate %101, %102 in 1 : vector<8x17xf32>, vector<8x495xf32> -> vector<8x512xf32>
    %104 = arith.mulf %103, %7 : vector<8x512xf32>
    %105 = vector.extract_strided_slice %100 {offsets = [0, 496], sizes = [8, 16], strides = [1, 1]} : vector<8x512xf32> to vector<8x16xf32>
    %106 = vector.extract_strided_slice %100 {offsets = [0, 0], sizes = [8, 496], strides = [1, 1]} : vector<8x512xf32> to vector<8x496xf32>
    %107 = tpu.concatenate %105, %106 in 1 : vector<8x16xf32>, vector<8x496xf32> -> vector<8x512xf32>
    %108 = arith.mulf %107, %10 : vector<8x512xf32>
    %109 = vector.extract_strided_slice %100 {offsets = [0, 497], sizes = [8, 15], strides = [1, 1]} : vector<8x512xf32> to vector<8x15xf32>
    %110 = vector.extract_strided_slice %100 {offsets = [0, 0], sizes = [8, 497], strides = [1, 1]} : vector<8x512xf32> to vector<8x497xf32>
    %111 = tpu.concatenate %109, %110 in 1 : vector<8x15xf32>, vector<8x497xf32> -> vector<8x512xf32>
    %112 = arith.mulf %111, %13 : vector<8x512xf32>
    %113 = vector.extract_strided_slice %100 {offsets = [0, 511], sizes = [8, 1], strides = [1, 1]} : vector<8x512xf32> to vector<8x1xf32>
    %114 = vector.extract_strided_slice %100 {offsets = [0, 0], sizes = [8, 511], strides = [1, 1]} : vector<8x512xf32> to vector<8x511xf32>
    %115 = tpu.concatenate %113, %114 in 1 : vector<8x1xf32>, vector<8x511xf32> -> vector<8x512xf32>
    %116 = arith.mulf %115, %16 : vector<8x512xf32>
    %117 = vector.extract_strided_slice %100 {offsets = [0, 1], sizes = [8, 511], strides = [1, 1]} : vector<8x512xf32> to vector<8x511xf32>
    %118 = vector.extract_strided_slice %100 {offsets = [0, 0], sizes = [8, 1], strides = [1, 1]} : vector<8x512xf32> to vector<8x1xf32>
    %119 = tpu.concatenate %117, %118 in 1 : vector<8x511xf32>, vector<8x1xf32> -> vector<8x512xf32>
    %120 = arith.mulf %119, %19 : vector<8x512xf32>
    %121 = vector.extract_strided_slice %100 {offsets = [0, 15], sizes = [8, 497], strides = [1, 1]} : vector<8x512xf32> to vector<8x497xf32>
    %122 = vector.extract_strided_slice %100 {offsets = [0, 0], sizes = [8, 15], strides = [1, 1]} : vector<8x512xf32> to vector<8x15xf32>
    %123 = tpu.concatenate %121, %122 in 1 : vector<8x497xf32>, vector<8x15xf32> -> vector<8x512xf32>
    %124 = arith.mulf %123, %22 : vector<8x512xf32>
    %125 = vector.extract_strided_slice %100 {offsets = [0, 16], sizes = [8, 496], strides = [1, 1]} : vector<8x512xf32> to vector<8x496xf32>
    %126 = vector.extract_strided_slice %100 {offsets = [0, 0], sizes = [8, 16], strides = [1, 1]} : vector<8x512xf32> to vector<8x16xf32>
    %127 = tpu.concatenate %125, %126 in 1 : vector<8x496xf32>, vector<8x16xf32> -> vector<8x512xf32>
    %128 = arith.mulf %127, %25 : vector<8x512xf32>
    %129 = vector.extract_strided_slice %100 {offsets = [0, 17], sizes = [8, 495], strides = [1, 1]} : vector<8x512xf32> to vector<8x495xf32>
    %130 = vector.extract_strided_slice %100 {offsets = [0, 0], sizes = [8, 17], strides = [1, 1]} : vector<8x512xf32> to vector<8x17xf32>
    %131 = tpu.concatenate %129, %130 in 1 : vector<8x495xf32>, vector<8x17xf32> -> vector<8x512xf32>
    %132 = arith.mulf %131, %28 : vector<8x512xf32>
    %c4_51 = arith.constant 4 : index
    %c0_52 = arith.constant 0 : index
    %c0_53 = arith.constant 0 : index
    %133 = vector.load %arg5[%c4_51, %c0_52, %c0_53] : memref<9x8x8xf32, #tpu.memory_space<vmem>>, vector<1x8x8xf32>
    %134 = vector.shape_cast %133 : vector<1x8x8xf32> to vector<8x8xf32>
    %cst_54 = arith.constant dense<0.000000e+00> : vector<8x512xf32>
    %135 = tpu.matmul %134, %100, %cst_54 {dimension_numbers = #tpu.dot_dimension_numbers<[1], [0], [0], [1], [0, 0, 1, 1], [], []>} : vector<8x8xf32>, vector<8x512xf32>, vector<8x512xf32> -> vector<8x512xf32>
    %c0_55 = arith.constant 0 : index
    %c0_56 = arith.constant 0 : index
    %136 = vector.load %arg6[%c0_55, %c0_56] : memref<8x1xf32, #tpu.memory_space<vmem>>, vector<8x1xf32>
    %137 = vector.broadcast %136 : vector<8x1xf32> to vector<8x512xf32>
    %138 = arith.addf %135, %137 : vector<8x512xf32>
    %c0_57 = arith.constant 0 : index
    %c0_58 = arith.constant 0 : index
    %c0_59 = arith.constant 0 : index
    %139 = vector.load %arg5[%c0_57, %c0_58, %c0_59] : memref<9x8x8xf32, #tpu.memory_space<vmem>>, vector<1x8x8xf32>
    %140 = vector.shape_cast %139 : vector<1x8x8xf32> to vector<8x8xf32>
    %cst_60 = arith.constant dense<0.000000e+00> : vector<8x512xf32>
    %141 = tpu.matmul %140, %104, %cst_60 {dimension_numbers = #tpu.dot_dimension_numbers<[1], [0], [0], [1], [0, 0, 1, 1], [], []>} : vector<8x8xf32>, vector<8x512xf32>, vector<8x512xf32> -> vector<8x512xf32>
    %142 = arith.addf %138, %141 : vector<8x512xf32>
    %c1_61 = arith.constant 1 : index
    %c0_62 = arith.constant 0 : index
    %c0_63 = arith.constant 0 : index
    %143 = vector.load %arg5[%c1_61, %c0_62, %c0_63] : memref<9x8x8xf32, #tpu.memory_space<vmem>>, vector<1x8x8xf32>
    %144 = vector.shape_cast %143 : vector<1x8x8xf32> to vector<8x8xf32>
    %cst_64 = arith.constant dense<0.000000e+00> : vector<8x512xf32>
    %145 = tpu.matmul %144, %108, %cst_64 {dimension_numbers = #tpu.dot_dimension_numbers<[1], [0], [0], [1], [0, 0, 1, 1], [], []>} : vector<8x8xf32>, vector<8x512xf32>, vector<8x512xf32> -> vector<8x512xf32>
    %146 = arith.addf %142, %145 : vector<8x512xf32>
    %c2_65 = arith.constant 2 : index
    %c0_66 = arith.constant 0 : index
    %c0_67 = arith.constant 0 : index
    %147 = vector.load %arg5[%c2_65, %c0_66, %c0_67] : memref<9x8x8xf32, #tpu.memory_space<vmem>>, vector<1x8x8xf32>
    %148 = vector.shape_cast %147 : vector<1x8x8xf32> to vector<8x8xf32>
    %cst_68 = arith.constant dense<0.000000e+00> : vector<8x512xf32>
    %149 = tpu.matmul %148, %112, %cst_68 {dimension_numbers = #tpu.dot_dimension_numbers<[1], [0], [0], [1], [0, 0, 1, 1], [], []>} : vector<8x8xf32>, vector<8x512xf32>, vector<8x512xf32> -> vector<8x512xf32>
    %150 = arith.addf %146, %149 : vector<8x512xf32>
    %c3_69 = arith.constant 3 : index
    %c0_70 = arith.constant 0 : index
    %c0_71 = arith.constant 0 : index
    %151 = vector.load %arg5[%c3_69, %c0_70, %c0_71] : memref<9x8x8xf32, #tpu.memory_space<vmem>>, vector<1x8x8xf32>
    %152 = vector.shape_cast %151 : vector<1x8x8xf32> to vector<8x8xf32>
    %cst_72 = arith.constant dense<0.000000e+00> : vector<8x512xf32>
    %153 = tpu.matmul %152, %116, %cst_72 {dimension_numbers = #tpu.dot_dimension_numbers<[1], [0], [0], [1], [0, 0, 1, 1], [], []>} : vector<8x8xf32>, vector<8x512xf32>, vector<8x512xf32> -> vector<8x512xf32>
    %154 = arith.addf %150, %153 : vector<8x512xf32>
    %c5_73 = arith.constant 5 : index
    %c0_74 = arith.constant 0 : index
    %c0_75 = arith.constant 0 : index
    %155 = vector.load %arg5[%c5_73, %c0_74, %c0_75] : memref<9x8x8xf32, #tpu.memory_space<vmem>>, vector<1x8x8xf32>
    %156 = vector.shape_cast %155 : vector<1x8x8xf32> to vector<8x8xf32>
    %cst_76 = arith.constant dense<0.000000e+00> : vector<8x512xf32>
    %157 = tpu.matmul %156, %120, %cst_76 {dimension_numbers = #tpu.dot_dimension_numbers<[1], [0], [0], [1], [0, 0, 1, 1], [], []>} : vector<8x8xf32>, vector<8x512xf32>, vector<8x512xf32> -> vector<8x512xf32>
    %158 = arith.addf %154, %157 : vector<8x512xf32>
    %c6_77 = arith.constant 6 : index
    %c0_78 = arith.constant 0 : index
    %c0_79 = arith.constant 0 : index
    %159 = vector.load %arg5[%c6_77, %c0_78, %c0_79] : memref<9x8x8xf32, #tpu.memory_space<vmem>>, vector<1x8x8xf32>
    %160 = vector.shape_cast %159 : vector<1x8x8xf32> to vector<8x8xf32>
    %cst_80 = arith.constant dense<0.000000e+00> : vector<8x512xf32>
    %161 = tpu.matmul %160, %124, %cst_80 {dimension_numbers = #tpu.dot_dimension_numbers<[1], [0], [0], [1], [0, 0, 1, 1], [], []>} : vector<8x8xf32>, vector<8x512xf32>, vector<8x512xf32> -> vector<8x512xf32>
    %162 = arith.addf %158, %161 : vector<8x512xf32>
    %c7_81 = arith.constant 7 : index
    %c0_82 = arith.constant 0 : index
    %c0_83 = arith.constant 0 : index
    %163 = vector.load %arg5[%c7_81, %c0_82, %c0_83] : memref<9x8x8xf32, #tpu.memory_space<vmem>>, vector<1x8x8xf32>
    %164 = vector.shape_cast %163 : vector<1x8x8xf32> to vector<8x8xf32>
    %cst_84 = arith.constant dense<0.000000e+00> : vector<8x512xf32>
    %165 = tpu.matmul %164, %128, %cst_84 {dimension_numbers = #tpu.dot_dimension_numbers<[1], [0], [0], [1], [0, 0, 1, 1], [], []>} : vector<8x8xf32>, vector<8x512xf32>, vector<8x512xf32> -> vector<8x512xf32>
    %166 = arith.addf %162, %165 : vector<8x512xf32>
    %c8_85 = arith.constant 8 : index
    %c0_86 = arith.constant 0 : index
    %c0_87 = arith.constant 0 : index
    %167 = vector.load %arg5[%c8_85, %c0_86, %c0_87] : memref<9x8x8xf32, #tpu.memory_space<vmem>>, vector<1x8x8xf32>
    %168 = vector.shape_cast %167 : vector<1x8x8xf32> to vector<8x8xf32>
    %cst_88 = arith.constant dense<0.000000e+00> : vector<8x512xf32>
    %169 = tpu.matmul %168, %132, %cst_88 {dimension_numbers = #tpu.dot_dimension_numbers<[1], [0], [0], [1], [0, 0, 1, 1], [], []>} : vector<8x8xf32>, vector<8x512xf32>, vector<8x512xf32> -> vector<8x512xf32>
    %170 = arith.addf %166, %169 : vector<8x512xf32>
    %cst_89 = arith.constant 0.000000e+00 : f32
    %171 = vector.broadcast %cst_89 : f32 to vector<8x512xf32>
    %172 = arith.maximumf %170, %171 : vector<8x512xf32>
    %c0_90 = arith.constant 0 : index
    %c0_91 = arith.constant 0 : index
    %173 = vector.load %arg7[%c0_90, %c0_91] : memref<8x8xf32, #tpu.memory_space<vmem>>, vector<8x8xf32>
    %cst_92 = arith.constant dense<0.000000e+00> : vector<8x512xf32>
    %174 = tpu.matmul %173, %172, %cst_92 {dimension_numbers = #tpu.dot_dimension_numbers<[1], [0], [0], [1], [0, 0, 1, 1], [], []>} : vector<8x8xf32>, vector<8x512xf32>, vector<8x512xf32> -> vector<8x512xf32>
    %c0_93 = arith.constant 0 : index
    %c0_94 = arith.constant 0 : index
    %175 = vector.load %arg8[%c0_93, %c0_94] : memref<8x1xf32, #tpu.memory_space<vmem>>, vector<8x1xf32>
    %176 = vector.broadcast %175 : vector<8x1xf32> to vector<8x512xf32>
    %177 = arith.addf %174, %176 : vector<8x512xf32>
    %178 = arith.addf %177, %4 : vector<8x512xf32>
    %179 = vector.extract_strided_slice %178 {offsets = [0, 0], sizes = [8, 256], strides = [1, 1]} : vector<8x512xf32> to vector<8x256xf32>
    %c0_95 = arith.constant 0 : index
    %c0_96 = arith.constant 0 : index
    %c0_97 = arith.constant 0 : index
    %180 = vector.load %arg9[%c0_95, %c0_96, %c0_97] : memref<2x8x256xf32, #tpu.memory_space<vmem>>, vector<1x8x256xf32>
    %181 = vector.shape_cast %180 : vector<1x8x256xf32> to vector<8x256xf32>
    %182 = vector.shape_cast %179 : vector<8x256xf32> to vector<1x8x256xf32>
    tpu.vector_store %arg9[%c0_95, %c0_96, %c0_97], %182 {strides = array<i32>} : memref<2x8x256xf32, #tpu.memory_space<vmem>>, vector<1x8x256xf32>,
    %183 = vector.extract_strided_slice %178 {offsets = [0, 256], sizes = [8, 256], strides = [1, 1]} : vector<8x512xf32> to vector<8x256xf32>
    %c1_98 = arith.constant 1 : index
    %c0_99 = arith.constant 0 : index
    %c0_100 = arith.constant 0 : index
    %184 = vector.load %arg9[%c1_98, %c0_99, %c0_100] : memref<2x8x256xf32, #tpu.memory_space<vmem>>, vector<1x8x256xf32>
    %185 = vector.shape_cast %184 : vector<1x8x256xf32> to vector<8x256xf32>
    %186 = vector.shape_cast %183 : vector<8x256xf32> to vector<1x8x256xf32>
    tpu.vector_store %arg9[%c1_98, %c0_99, %c0_100], %186 {strides = array<i32>} : memref<2x8x256xf32, #tpu.memory_space<vmem>>, vector<1x8x256xf32>,
    return
  }
  func.func @transform_0(%arg0: i32) -> (i32, i32, i32) {
    %c0_i32 = arith.constant 0 : i32
    %c0_i32_0 = arith.constant 0 : i32
    %c0_i32_1 = arith.constant 0 : i32
    return %arg0, %c0_i32, %c0_i32_0 : i32, i32, i32
  }
  func.func @transform_1(%arg0: i32) -> (i32, i32) {
    %c0_i32 = arith.constant 0 : i32
    %c0_i32_0 = arith.constant 0 : i32
    %c0_i32_1 = arith.constant 0 : i32
    return %c0_i32, %c0_i32_0 : i32, i32
  }
  func.func @transform_2(%arg0: i32) -> (i32, i32, i32) {
    %c0_i32 = arith.constant 0 : i32
    %c0_i32_0 = arith.constant 0 : i32
    %c0_i32_1 = arith.constant 0 : i32
    %c0_i32_2 = arith.constant 0 : i32
    return %c0_i32, %c0_i32_0, %c0_i32_1 : i32, i32, i32
  }
  func.func @transform_3(%arg0: i32) -> (i32, i32) {
    %c0_i32 = arith.constant 0 : i32
    %c0_i32_0 = arith.constant 0 : i32
    %c0_i32_1 = arith.constant 0 : i32
    return %c0_i32, %c0_i32_0 : i32, i32
  }
  func.func @transform_4(%arg0: i32) -> (i32, i32, i32) {
    %c0_i32 = arith.constant 0 : i32
    %c0_i32_0 = arith.constant 0 : i32
    %c0_i32_1 = arith.constant 0 : i32
    %c0_i32_2 = arith.constant 0 : i32
    return %c0_i32, %c0_i32_0, %c0_i32_1 : i32, i32, i32
  }
  func.func @transform_5(%arg0: i32) -> (i32, i32) {
    %c0_i32 = arith.constant 0 : i32
    %c0_i32_0 = arith.constant 0 : i32
    %c0_i32_1 = arith.constant 0 : i32
    return %c0_i32, %c0_i32_0 : i32, i32
  }
  func.func @transform_6(%arg0: i32) -> (i32, i32) {
    %c0_i32 = arith.constant 0 : i32
    %c0_i32_0 = arith.constant 0 : i32
    %c0_i32_1 = arith.constant 0 : i32
    return %c0_i32, %c0_i32_0 : i32, i32
  }
  func.func @transform_7(%arg0: i32) -> (i32, i32) {
    %c0_i32 = arith.constant 0 : i32
    %c0_i32_0 = arith.constant 0 : i32
    %c0_i32_1 = arith.constant 0 : i32
    return %c0_i32, %c0_i32_0 : i32, i32
  }
  func.func @transform_8(%arg0: i32) -> (i32, i32, i32) {
    %c0_i32 = arith.constant 0 : i32
    %c0_i32_0 = arith.constant 0 : i32
    %c0_i32_1 = arith.constant 0 : i32
    return %arg0, %c0_i32, %c0_i32_0 : i32, i32, i32
  }
}

</mosaic_0001>

<bundles_post_ra>
// kernel: tpu_custom_call.1
= control target key start
LH: loop header
LB: loop body
LE: loop exit
PB: predicated region body
PF: predicated region fallthrough
CT: control target
= control target key end

     0   :  { %s3653_s9 = smov 17   ;;  %v3654_v4 = vmov 0.0   ;;  %vm406_vm0 = vcmask 64512   ;;  %s4209_s0 = inlined_call_operand.vmem [shape: f32[2,8,256], index: 0, kind: input, shape index: {}]   ;;  %s4210_s1 = inlined_call_operand.vmem [shape: f32[8,512], index: 1, kind: input, shape index: {}]   ;;  %s4211_s2 = inlined_call_operand.vmem [shape: f32[9,8,8], index: 2, kind: input, shape index: {}]   ;;  %s4212_s3 = inlined_call_operand.vmem [shape: f32[8,1], index: 3, kind: input, shape index: {}]   ;;  %s4213_s4 = inlined_call_operand.vmem [shape: f32[9,8,8], index: 4, kind: input, shape index: {}]   ;;  %s4214_s5 = inlined_call_operand.vmem [shape: f32[8,1], index: 5, kind: input, shape index: {}]   ;;  %s4215_s6 = inlined_call_operand.vmem [shape: f32[8,8], index: 6, kind: input, shape index: {}]   ;;  %s4216_s7 = inlined_call_operand.vmem [shape: f32[8,1], index: 7, kind: input, shape index: {}]   ;;  %s4217_s8 = inlined_call_operand.hbm [shape: f32[2,8,256], index: 8, kind: output, shape index: {}]  }
   0x1   :  { %v3477_v0 = vld [vmem:[%s4209_s0 + $0x18] sm:$0xff]  ;;  %v31_v1 = vld [vmem:[%s4209_s0 + $0x8] sm:$0xff]  ;;  %v3476_v2 = vld [vmem:[%s4209_s0 + $0x10] sm:$0xff]  ;;  %474 = vmatprep.mubr.f32.mxu0 %v3654_v4  ;;  %545 = vmatprep.mubr.f32.mxu1 %v3654_v4 }
   0x2   :  { %219 = vrot.lane.b32.xlu0 %v3477_v0, %s3653_s9  ;;  %227 = vrot.lane.b32.xlu1 %v31_v1, %s3653_s9  ;;  %v30_v3 = vld [vmem:[%s4209_s0] sm:$0xff] }
   0x3   :  { %481 = vmatprep.subr.mxu1 %v3477_v0  ;;  %410 = vmatprep.subr.mxu0 %v31_v1  ;;  %v3485_v5 = vld [vmem:[%s4211_s2 + $0x20] sm:$0xff] }
   0x4   :  { %411 = vmatpush1.msra.mxu0 %v30_v3  ;;  %482 = vmatpush1.msra.mxu1 %v3476_v2 }
   0x6   :  { %229 = vrot.lane.b32.xlu1 %v3476_v2, %s3653_s9  ;;  %225 = vrot.lane.b32.xlu0 %v30_v3, %s3653_s9 }
   0x7   :  { %13 = vsyncpa [#allocation3], 0  ;;  %3486 = vmatmul.mubr.msk.f32.vlgmr.msra.gmra.mrb[0].mxu0 %vm406_vm0, %v3485_v5  ;;  %3487 = vmatmul.mubr.msk.f32.vlgmr.msra.gmra.mrb[0].mxu1 %vm406_vm0, %v3485_v5  ;;  %s3655_s16 = smov 16   ;;  %s3656_s17 = smov 15   ;;  %v3661_v6 = vmov 0   ;;  %v400_v7 = vld [vmem:[%s4212_s3] sm:$0xff]  ;;  %v37_v8 = vlaneseq }
   0x8   :  { %620 = vmatprep.mubr.f32.mxu0 %v3654_v4  ;;  %691 = vmatprep.mubr.f32.mxu1 %v3654_v4  ;;  %s3657_s18 = smov 1   ;;  %s3658_s19 = smov 127   ;;  %v35_v14 = vld [vmem:[%s4210_s1] ss:$8 sm:$0xf]  ;;  %vm231_vm1 = vcmask 138240  }
   0x9   :  { %s3659_s20 = smov 113   ;;  %s3660_s21 = smov 112   ;;  %3623 = vset.pattern.permute.xlu0 %v3661_v6  ;;  %3624 = vset.pattern.permute.xlu1 %v3661_v6  ;;  %v38_v9 = vshrl.u32 %v37_v8, 7  ;;  %v552_v31 = vld [vmem:[%s4211_s2] sm:$0xff]  ;;  %vm253_vm2 = vcmask 130048   ;;  %v3490_v49 = vld [vmem:[%s4211_s2 + $0x8] sm:$0xff] }
   0xa   :  { %247 = vrot.lane.b32.xlu1 %v30_v3, %s3655_s16  ;;  %244 = vrot.lane.b32.xlu0 %v3477_v0, %s3655_s16  ;;  %s3662_s22 = smov 111   ;;  %v3478_v33 = vld [vmem:[%s4210_s1 + $0x1] ss:$8 sm:$0xf]  ;;  %vm275_vm3 = vcmask 121856   ;;  %vm297_vm4 = vcmask 7168  }
   0xb   :  { %v3766_v10 = vsub.s32 2, %v38_v9  ;;  %v3768_v11 = vsub.s32 3, %v38_v9  ;;  %v3770_v12 = vsub.s32 0, %v38_v9  ;;  %v3772_v13 = vsub.s32 1, %v38_v9 }
   0xc   :  { %v3479_v51 = vld [vmem:[%s4210_s1 + $0x2] ss:$8 sm:$0xf]  ;;  %v3480_v6 = vld [vmem:[%s4210_s1 + $0x3] ss:$8 sm:$0xf] }
   0xd   :  { %v3778_v17 = vrot.slane %v35_v14, %v3766_v10  ;;  %v3781_v18 = vrot.slane %v35_v14, %v3768_v11  ;;  %v3784_v19 = vrot.slane %v35_v14, %v3770_v12  ;;  %v3787_v20 = vrot.slane %v35_v14, %v3772_v13 }
   0xe   :  { %251 = vrot.lane.b32.xlu1 %v3476_v2, %s3655_s16  ;;  %249 = vrot.lane.b32.xlu0 %v31_v1, %s3655_s16  ;;  %v3806_v35 = vrot.slane %v3478_v33, %v3768_v11  ;;  %v3809_v36 = vrot.slane %v3478_v33, %v3772_v13  ;;  %v3812_v37 = vrot.slane %v3478_v33, %v3766_v10  ;;  %vm318_vm5 = vcmask 1039360  }
   0xf   :  { %v3815_v38 = vrot.slane %v3478_v33, %v3770_v12  ;;  %v3836_v53 = vrot.slane %v3479_v51, %v3768_v11  ;;  %v3839_v54 = vrot.slane %v3479_v51, %v3772_v13  ;;  %v3842_v55 = vrot.slane %v3479_v51, %v3766_v10 }
  0x10   :  { %v3845_v56 = vrot.slane %v3479_v51, %v3770_v12  ;;  %v3866_v8 = vrot.slane %v3480_v6, %v3768_v11  ;;  %v3869_v9 = vrot.slane %v3480_v6, %v3772_v13  ;;  %v3872_v14 = vrot.slane %v3480_v6, %v3766_v10 }
  0x11   :  { %vm340_vm6 = vcmask 924672   ;;  %vm362_vm7 = vcmask 916480   ;;  %vm384_vm8 = vcmask 908288  }
  0x12   :  { %269 = vrot.lane.b32.xlu1 %v30_v3, %s3656_s17  ;;  %266 = vrot.lane.b32.xlu0 %v3477_v0, %s3656_s17 }
  0x16   :  { %273 = vrot.lane.b32.xlu1 %v3476_v2, %s3656_s17  ;;  %271 = vrot.lane.b32.xlu0 %v31_v1, %s3656_s17 }
  0x1a   :  { %291 = vrot.lane.b32.xlu1 %v30_v3, %s3657_s18  ;;  %288 = vrot.lane.b32.xlu0 %v3477_v0, %s3657_s18 }
  0x1e   :  { %295 = vrot.lane.b32.xlu1 %v3476_v2, %s3657_s18  ;;  %293 = vrot.lane.b32.xlu0 %v31_v1, %s3657_s18 }
  0x22   :  { %312 = vrot.lane.b32.xlu1 %v31_v1, %s3658_s19  ;;  %310 = vrot.lane.b32.xlu0 %v30_v3, %s3658_s19 }
  0x26   :  { %316 = vrot.lane.b32.xlu1 %v3477_v0, %s3658_s19  ;;  %314 = vrot.lane.b32.xlu0 %v3476_v2, %s3658_s19 }
  0x2a   :  { %334 = vrot.lane.b32.xlu1 %v31_v1, %s3659_s20  ;;  %332 = vrot.lane.b32.xlu0 %v30_v3, %s3659_s20 }
  0x2e   :  { %338 = vrot.lane.b32.xlu1 %v3477_v0, %s3659_s20  ;;  %336 = vrot.lane.b32.xlu0 %v3476_v2, %s3659_s20 }
  0x32   :  { %356 = vrot.lane.b32.xlu1 %v31_v1, %s3660_s21  ;;  %354 = vrot.lane.b32.xlu0 %v30_v3, %s3660_s21 }
  0x36   :  { %360 = vrot.lane.b32.xlu1 %v3477_v0, %s3660_s21  ;;  %358 = vrot.lane.b32.xlu0 %v3476_v2, %s3660_s21 }
  0x3a   :  { %378 = vrot.lane.b32.xlu1 %v31_v1, %s3662_s22  ;;  %376 = vrot.lane.b32.xlu0 %v30_v3, %s3662_s22  ;;  %v3493_v3 = vld [vmem:[%s4211_s2 + $0x10] sm:$0xff] }
  0x3e   :  { %382 = vrot.lane.b32.xlu1 %v3477_v0, %s3662_s22  ;;  %380 = vrot.lane.b32.xlu0 %v3476_v2, %s3662_s22 }
  0x42   :  { %403 = vperm.xlu0 %3623, %v400_v7  }
  0x74   :  { %v220_v15 = vpop.permute.xlu0 %219  ;;  %v228_v16 = vpop.permute.xlu1 %227 }
  0x78   :  { %v230_v21 = vpop.permute.xlu1 %229  ;;  %v226_v22 = vpop.permute.xlu0 %225 }
  0x79   :  { %v233_v23 = vsel %vm231_vm1, %v228_v16, %v230_v21  ;;  %v234_v24 = vsel %vm231_vm1, %v230_v21, %v220_v15  ;;  %v232_v25 = vsel %vm231_vm1, %v226_v22, %v228_v16  ;;  %v239_v26 = vsel %vm231_vm1, %v220_v15, %v226_v22 }
  0x7a   :  { %v242_v27 = vmul.f32 %v233_v23, %v3778_v17  ;;  %v243_v28 = vmul.f32 %v234_v24, %v3781_v18  ;;  %v240_v29 = vmul.f32 %v239_v26, %v3784_v19  ;;  %v241_v30 = vmul.f32 %v232_v25, %v3787_v20 }
  0x7b   :  { %v3875_v15 = vrot.slane %v3480_v6, %v3770_v12 }
  0x7c   :  { %627 = vmatprep.subr.mxu1 %v243_v28  ;;  %v248_v32 = vpop.permute.xlu1 %247  ;;  %v245_v34 = vpop.permute.xlu0 %244  ;;  %556 = vmatprep.subr.mxu0 %v241_v30  ;;  %v3496_v30 = vld [vmem:[%s4211_s2 + $0x18] sm:$0xff] }
  0x7d   :  { %557 = vmatpush1.msra.mxu0 %v240_v29  ;;  %628 = vmatpush1.msra.mxu1 %v242_v27  ;;  %v261_v39 = vsel %vm253_vm2, %v245_v34, %v248_v32 }
  0x7e   :  { %3488 = vmatmul.mubr.msk.f32.vlgmr.msra.gmra.mrb[0].mxu0 %vm406_vm0, %v552_v31  ;;  %3489 = vmatmul.mubr.msk.f32.vlgmr.msra.gmra.mrb[0].mxu1 %vm406_vm0, %v552_v31  ;;  %v262_v48 = vmul.f32 %v261_v39, %v3815_v38 }
  0x7f   :  { %771 = vmatprep.mubr.f32.mxu0 %v3654_v4  ;;  %842 = vmatprep.mubr.f32.mxu1 %v3654_v4 }
  0x80   :  { %v252_v40 = vpop.permute.xlu1 %251  ;;  %v250_v41 = vpop.permute.xlu0 %249 }
  0x81   :  { %v256_v42 = vsel %vm253_vm2, %v252_v40, %v245_v34  ;;  %v254_v43 = vsel %vm253_vm2, %v248_v32, %v250_v41  ;;  %v255_v44 = vsel %vm253_vm2, %v250_v41, %v252_v40  ;;  %v3481_v32 = vld [vmem:[%s4210_s1 + $0x4] ss:$8 sm:$0xf] }
  0x82   :  { %v265_v45 = vmul.f32 %v256_v42, %v3806_v35  ;;  %v263_v46 = vmul.f32 %v254_v43, %v3809_v36  ;;  %v264_v47 = vmul.f32 %v255_v44, %v3812_v37  ;;  %v3896_v34 = vrot.slane %v3481_v32, %v3768_v11 }
  0x83   :  { %v3899_v39 = vrot.slane %v3481_v32, %v3772_v13  ;;  %v3902_v40 = vrot.slane %v3481_v32, %v3766_v10  ;;  %v3905_v41 = vrot.slane %v3481_v32, %v3770_v12 }
  0x84   :  { %v270_v50 = vpop.permute.xlu1 %269  ;;  %778 = vmatprep.subr.mxu1 %v265_v45  ;;  %v267_v52 = vpop.permute.xlu0 %266  ;;  %707 = vmatprep.subr.mxu0 %v263_v46 }
  0x85   :  { %708 = vmatpush1.msra.mxu0 %v262_v48  ;;  %779 = vmatpush1.msra.mxu1 %v264_v47  ;;  %v283_v57 = vsel %vm275_vm3, %v267_v52, %v270_v50 }
  0x86   :  { %3491 = vmatmul.mubr.msk.f32.vlgmr.msra.gmra.mrb[0].mxu0 %vm406_vm0, %v3490_v49  ;;  %3492 = vmatmul.mubr.msk.f32.vlgmr.msra.gmra.mrb[0].mxu1 %vm406_vm0, %v3490_v49  ;;  %v284_v2 = vmul.f32 %v283_v57, %v3845_v56 }
  0x87   :  { %922 = vmatprep.mubr.f32.mxu0 %v3654_v4  ;;  %993 = vmatprep.mubr.f32.mxu1 %v3654_v4 }
  0x88   :  { %v274_v58 = vpop.permute.xlu1 %273  ;;  %v272_v59 = vpop.permute.xlu0 %271 }
  0x89   :  { %v278_v60 = vsel %vm275_vm3, %v274_v58, %v267_v52  ;;  %v276_v61 = vsel %vm275_vm3, %v270_v50, %v272_v59  ;;  %v277_v62 = vsel %vm275_vm3, %v272_v59, %v274_v58  ;;  %v3499_v52 = vld [vmem:[%s4211_s2 + $0x28] sm:$0xff] }
  0x8a   :  { %v287_v63 = vmul.f32 %v278_v60, %v3836_v53  ;;  %v285_v0 = vmul.f32 %v276_v61, %v3839_v54  ;;  %v286_v1 = vmul.f32 %v277_v62, %v3842_v55  ;;  %v3482_v58 = vld [vmem:[%s4210_s1 + $0x5] ss:$8 sm:$0xf] }
  0x8b   :  { %v3926_v60 = vrot.slane %v3482_v58, %v3768_v11  ;;  %v3929_v61 = vrot.slane %v3482_v58, %v3772_v13  ;;  %v3932_v62 = vrot.slane %v3482_v58, %v3766_v10 }
  0x8c   :  { %v292_v5 = vpop.permute.xlu1 %291  ;;  %929 = vmatprep.subr.mxu1 %v287_v63  ;;  %v289_v7 = vpop.permute.xlu0 %288  ;;  %858 = vmatprep.subr.mxu0 %v285_v0  ;;  %v3935_v63 = vrot.slane %v3482_v58, %v3770_v12 }
  0x8d   :  { %859 = vmatpush1.msra.mxu0 %v284_v2  ;;  %930 = vmatpush1.msra.mxu1 %v286_v1  ;;  %v305_v16 = vsel %vm297_vm4, %v289_v7, %v292_v5 }
  0x8e   :  { %3494 = vmatmul.mubr.msk.f32.vlgmr.msra.gmra.mrb[0].mxu0 %vm406_vm0, %v3493_v3  ;;  %3495 = vmatmul.mubr.msk.f32.vlgmr.msra.gmra.mrb[0].mxu1 %vm406_vm0, %v3493_v3  ;;  %v306_v29 = vmul.f32 %v305_v16, %v3875_v15 }
  0x8f   :  { %1073 = vmatprep.mubr.f32.mxu0 %v3654_v4  ;;  %1144 = vmatprep.mubr.f32.mxu1 %v3654_v4 }
  0x90   :  { %v296_v21 = vpop.permute.xlu1 %295  ;;  %v294_v22 = vpop.permute.xlu0 %293 }
  0x91   :  { %v300_v23 = vsel %vm297_vm4, %v296_v21, %v289_v7  ;;  %v298_v24 = vsel %vm297_vm4, %v292_v5, %v294_v22  ;;  %v299_v25 = vsel %vm297_vm4, %v294_v22, %v296_v21 }
  0x92   :  { %v309_v26 = vmul.f32 %v300_v23, %v3866_v8  ;;  %v307_v27 = vmul.f32 %v298_v24, %v3869_v9  ;;  %v308_v28 = vmul.f32 %v299_v25, %v3872_v14  ;;  %v3502_v23 = vld [vmem:[%s4211_s2 + $0x30] sm:$0xff] }
  0x93   :  { %v3483_v25 = vld [vmem:[%s4210_s1 + $0x6] ss:$8 sm:$0xf] }
  0x94   :  { %v313_v31 = vpop.permute.xlu1 %312  ;;  %1080 = vmatprep.subr.mxu1 %v309_v26  ;;  %v311_v33 = vpop.permute.xlu0 %310  ;;  %1009 = vmatprep.subr.mxu0 %v307_v27  ;;  %v3956_v27 = vrot.slane %v3483_v25, %v3768_v11 }
  0x95   :  { %1010 = vmatpush1.msra.mxu0 %v306_v29  ;;  %1081 = vmatpush1.msra.mxu1 %v308_v28  ;;  %v319_v42 = vsel %vm318_vm5, %v311_v33, %v313_v31  ;;  %v3959_v28 = vrot.slane %v3483_v25, %v3772_v13  ;;  %v3962_v29 = vrot.slane %v3483_v25, %v3766_v10 }
  0x96   :  { %3497 = vmatmul.mubr.msk.f32.vlgmr.msra.gmra.mrb[0].mxu0 %vm406_vm0, %v3496_v30  ;;  %3498 = vmatmul.mubr.msk.f32.vlgmr.msra.gmra.mrb[0].mxu1 %vm406_vm0, %v3496_v30  ;;  %v328_v51 = vmul.f32 %v319_v42, %v3905_v41  ;;  %v3965_v30 = vrot.slane %v3483_v25, %v3770_v12 }
  0x97   :  { %1224 = vmatprep.mubr.f32.mxu0 %v3654_v4  ;;  %1295 = vmatprep.mubr.f32.mxu1 %v3654_v4 }
  0x98   :  { %v317_v43 = vpop.permute.xlu1 %316  ;;  %v315_v44 = vpop.permute.xlu0 %314 }
  0x99   :  { %v327_v45 = vsel %vm318_vm5, %v317_v43, %v311_v33  ;;  %v320_v46 = vsel %vm318_vm5, %v313_v31, %v315_v44  ;;  %v321_v47 = vsel %vm318_vm5, %v315_v44, %v317_v43 }
  0x9a   :  { %v331_v48 = vmul.f32 %v327_v45, %v3896_v34  ;;  %v329_v49 = vmul.f32 %v320_v46, %v3899_v39  ;;  %v330_v50 = vmul.f32 %v321_v47, %v3902_v40 }
  0x9c   :  { %v335_v57 = vpop.permute.xlu1 %334  ;;  %1231 = vmatprep.subr.mxu1 %v331_v48  ;;  %v333_v59 = vpop.permute.xlu0 %332  ;;  %1160 = vmatprep.subr.mxu0 %v329_v49  ;;  %v3505_v49 = vld [vmem:[%s4211_s2 + $0x38] sm:$0xff] }
  0x9d   :  { %1161 = vmatpush1.msra.mxu0 %v328_v51  ;;  %1232 = vmatpush1.msra.mxu1 %v330_v50  ;;  %v341_v0 = vsel %vm340_vm6, %v333_v59, %v335_v57  ;;  %v3484_v51 = vld [vmem:[%s4210_s1 + $0x7] ss:$8 sm:$0xf] }
  0x9e   :  { %3500 = vmatmul.mubr.msk.f32.vlgmr.msra.gmra.mrb[0].mxu0 %vm406_vm0, %v3499_v52  ;;  %3501 = vmatmul.mubr.msk.f32.vlgmr.msra.gmra.mrb[0].mxu1 %vm406_vm0, %v3499_v52  ;;  %v350_v22 = vmul.f32 %v341_v0, %v3935_v63  ;;  %v3989_v58 = vrot.slane %v3484_v51, %v3772_v13  ;;  %v3995_v0 = vrot.slane %v3484_v51, %v3770_v12 }
  0x9f   :  { %1375 = vmatprep.mubr.f32.mxu0 %v3654_v4  ;;  %1446 = vmatprep.mubr.f32.mxu1 %v3654_v4 }
  0xa0   :  { %v339_v1 = vpop.permute.xlu1 %338  ;;  %v337_v2 = vpop.permute.xlu0 %336 }
  0xa1   :  { %v349_v3 = vsel %vm340_vm6, %v339_v1, %v333_v59  ;;  %v342_v5 = vsel %vm340_vm6, %v335_v57, %v337_v2  ;;  %v343_v6 = vsel %vm340_vm6, %v337_v2, %v339_v1  ;;  %v3986_v57 = vrot.slane %v3484_v51, %v3768_v11 }
  0xa2   :  { %v353_v7 = vmul.f32 %v349_v3, %v3926_v60  ;;  %v351_v16 = vmul.f32 %v342_v5, %v3929_v61  ;;  %v352_v21 = vmul.f32 %v343_v6, %v3932_v62  ;;  %v3992_v59 = vrot.slane %v3484_v51, %v3766_v10 }
  0xa4   :  { %v357_v24 = vpop.permute.xlu1 %356  ;;  %1382 = vmatprep.subr.mxu1 %v353_v7  ;;  %v355_v26 = vpop.permute.xlu0 %354  ;;  %1311 = vmatprep.subr.mxu0 %v351_v16  ;;  %v3508_v16 = vld [vmem:[%s4211_s2 + $0x40] sm:$0xff] }
  0xa5   :  { %1312 = vmatpush1.msra.mxu0 %v350_v22  ;;  %1383 = vmatpush1.msra.mxu1 %v352_v21  ;;  %v363_v31 = vsel %vm362_vm7, %v355_v26, %v357_v24 }
  0xa6   :  { %3503 = vmatmul.mubr.msk.f32.vlgmr.msra.gmra.mrb[0].mxu0 %vm406_vm0, %v3502_v23  ;;  %3504 = vmatmul.mubr.msk.f32.vlgmr.msra.gmra.mrb[0].mxu1 %vm406_vm0, %v3502_v23  ;;  %v372_v48 = vmul.f32 %v363_v31, %v3965_v30 }
  0xa7   :  { %1526 = vmatprep.mubr.f32.mxu0 %v3654_v4  ;;  %1597 = vmatprep.mubr.f32.mxu1 %v3654_v4 }
  0xa8   :  { %v361_v32 = vpop.permute.xlu1 %360  ;;  %v359_v33 = vpop.permute.xlu0 %358 }
  0xa9   :  { %v371_v42 = vsel %vm362_vm7, %v361_v32, %v355_v26  ;;  %v364_v43 = vsel %vm362_vm7, %v357_v24, %v359_v33  ;;  %v365_v44 = vsel %vm362_vm7, %v359_v33, %v361_v32 }
  0xaa   :  { %v375_v45 = vmul.f32 %v371_v42, %v3956_v27  ;;  %v373_v46 = vmul.f32 %v364_v43, %v3959_v28  ;;  %v374_v47 = vmul.f32 %v365_v44, %v3962_v29 }
  0xac   :  { %v379_v50 = vpop.permute.xlu1 %378  ;;  %1533 = vmatprep.subr.mxu1 %v375_v45  ;;  %v377_v52 = vpop.permute.xlu0 %376  ;;  %1462 = vmatprep.subr.mxu0 %v373_v46  ;;  %v3511_v46 = vld [vmem:[%s4213_s4 + $0x20] sm:$0xff] }
  0xad   :  { %1463 = vmatpush1.msra.mxu0 %v372_v48  ;;  %1534 = vmatpush1.msra.mxu1 %v374_v47  ;;  %v385_v1 = vsel %vm384_vm8, %v377_v52, %v379_v50  ;;  %v1937_v47 = vld [vmem:[%s4214_s5] sm:$0xff] }
  0xae   :  { %3506 = vmatmul.mubr.msk.f32.vlgmr.msra.gmra.mrb[0].mxu0 %vm406_vm0, %v3505_v49  ;;  %3507 = vmatmul.mubr.msk.f32.vlgmr.msra.gmra.mrb[0].mxu1 %vm406_vm0, %v3505_v49  ;;  %v394_v7 = vmul.f32 %v385_v1, %v3995_v0 }
  0xaf   :  { %1677 = vmatprep.mubr.f32.mxu0 %v3654_v4  ;;  %1748 = vmatprep.mubr.f32.mxu1 %v3654_v4 }
  0xb0   :  { %v383_v2 = vpop.permute.xlu1 %382  ;;  %v381_v3 = vpop.permute.xlu0 %380 }
  0xb1   :  { %v393_v11 = vsel %vm384_vm8, %v383_v2, %v377_v52  ;;  %v386_v5 = vsel %vm384_vm8, %v379_v50, %v381_v3  ;;  %v387_v13 = vsel %vm384_vm8, %v381_v3, %v383_v2 }
  0xb2   :  { %v397_v10 = vmul.f32 %v393_v11, %v3986_v57  ;;  %v395_v6 = vmul.f32 %v386_v5, %v3989_v58  ;;  %v396_v12 = vmul.f32 %v387_v13, %v3992_v59 }
  0xb4   :  { %1613 = vmatprep.subr.mxu0 %v395_v6  ;;  %1684 = vmatprep.subr.mxu1 %v397_v10 }
  0xb5   :  { %1614 = vmatpush1.msra.mxu0 %v394_v7  ;;  %1685 = vmatpush1.msra.mxu1 %v396_v12  ;;  %v2088_v12 = vld [vmem:[%s4213_s4] sm:$0xff] }
  0xb6   :  { %3509 = vmatmul.mubr.msk.f32.vlgmr.msra.gmra.mrb[0].mxu0 %vm406_vm0, %v3508_v16  ;;  %3510 = vmatmul.mubr.msk.f32.vlgmr.msra.gmra.mrb[0].mxu1 %vm406_vm0, %v3508_v16 }
  0xb7   :  { %2010 = vmatprep.mubr.f32.mxu0 %v3654_v4  ;;  %2081 = vmatprep.mubr.f32.mxu1 %v3654_v4 }
  0xc1   :  { %v404_v21 = vpop.permute.xlu0 %403 }
 0x189   :  { %v1750_v22 = vpop.f32.mrb[0].mxu1  ;;  %v1679_v23 = vpop.f32.mrb[0].mxu0 }
 0x18a   :  { %v3541_v24 = vadd.f32 %v1750_v22, %v404_v21  ;;  %v3539_v25 = vadd.f32 %v1679_v23, %v404_v21  ;;  %v1681_v26 = vpop.f32.mrb[1].mxu0  ;;  %v1752_v31 = vpop.f32.mrb[1].mxu1 }
 0x18b   :  { %v3540_v32 = vadd.f32 %v1681_v26, %v404_v21  ;;  %v3542_v33 = vadd.f32 %v1752_v31, %v404_v21 }
 0x18c   :  { %v1759_v42 = vmax.f32 %v3539_v25, 0.0  ;;  %v1761_v45 = vmax.f32 %v3541_v24, 0.0 }
 0x18d   :  { %v1760_v43 = vmax.f32 %v3540_v32, 0.0  ;;  %v1762_v44 = vmax.f32 %v3542_v33, 0.0 }
 0x18e   :  { %1770 = vrot.lane.b32.xlu1 %v1759_v42, %s3653_s9 }
 0x18f   :  { %2017 = vmatprep.subr.mxu1 %v1762_v44  ;;  %1772 = vrot.lane.b32.xlu0 %v1760_v43, %s3653_s9 }
 0x190   :  { %1946 = vmatprep.subr.mxu0 %v1760_v43  ;;  %2018 = vmatpush1.msra.mxu1 %v1761_v45 }
 0x191   :  { %1947 = vmatpush1.msra.mxu0 %v1759_v42  ;;  %3513 = vmatmul.mubr.msk.f32.vlgmr.msra.gmra.mrb[2].mxu1 %vm406_vm0, %v3511_v46 }
 0x192   :  { %1774 = vrot.lane.b32.xlu1 %v1761_v45, %s3653_s9  ;;  %3512 = vmatmul.mubr.msk.f32.vlgmr.msra.gmra.mrb[2].mxu0 %vm406_vm0, %v3511_v46 }
 0x193   :  { %1788 = vrot.lane.b32.xlu0 %v1762_v44, %s3655_s16  ;;  %2156 = vmatprep.mubr.f32.mxu0 %v3654_v4 }
 0x194   :  { %2227 = vmatprep.mubr.f32.mxu1 %v3654_v4 }
 0x196   :  { %1764 = vrot.lane.b32.xlu1 %v1762_v44, %s3653_s9 }
 0x197   :  { %1793 = vrot.lane.b32.xlu0 %v1760_v43, %s3655_s16 }
 0x19a   :  { %1791 = vrot.lane.b32.xlu1 %v1759_v42, %s3655_s16 }
 0x19b   :  { %1809 = vrot.lane.b32.xlu0 %v1762_v44, %s3656_s17 }
 0x19e   :  { %1795 = vrot.lane.b32.xlu1 %v1761_v45, %s3655_s16 }
 0x19f   :  { %1814 = vrot.lane.b32.xlu0 %v1760_v43, %s3656_s17 }
 0x1a2   :  { %1812 = vrot.lane.b32.xlu1 %v1759_v42, %s3656_s17 }
 0x1a3   :  { %1830 = vrot.lane.b32.xlu0 %v1762_v44, %s3657_s18 }
 0x1a6   :  { %1816 = vrot.lane.b32.xlu1 %v1761_v45, %s3656_s17 }
 0x1a7   :  { %1835 = vrot.lane.b32.xlu0 %v1760_v43, %s3657_s18 }
 0x1aa   :  { %1833 = vrot.lane.b32.xlu1 %v1759_v42, %s3657_s18 }
 0x1ab   :  { %1851 = vrot.lane.b32.xlu0 %v1759_v42, %s3658_s19 }
 0x1ae   :  { %1837 = vrot.lane.b32.xlu1 %v1761_v45, %s3657_s18 }
 0x1af   :  { %1855 = vrot.lane.b32.xlu0 %v1761_v45, %s3658_s19 }
 0x1b2   :  { %1853 = vrot.lane.b32.xlu1 %v1760_v43, %s3658_s19 }
 0x1b3   :  { %1872 = vrot.lane.b32.xlu0 %v1759_v42, %s3659_s20 }
 0x1b6   :  { %1857 = vrot.lane.b32.xlu1 %v1762_v44, %s3658_s19 }
 0x1b7   :  { %1876 = vrot.lane.b32.xlu0 %v1761_v45, %s3659_s20 }
 0x1ba   :  { %1874 = vrot.lane.b32.xlu1 %v1760_v43, %s3659_s20 }
 0x1bb   :  { %1893 = vrot.lane.b32.xlu0 %v1759_v42, %s3660_s21 }
 0x1be   :  { %1878 = vrot.lane.b32.xlu1 %v1762_v44, %s3659_s20 }
 0x1bf   :  { %1897 = vrot.lane.b32.xlu0 %v1761_v45, %s3660_s21 }
 0x1c2   :  { %1895 = vrot.lane.b32.xlu1 %v1760_v43, %s3660_s21 }
 0x1c3   :  { %1914 = vrot.lane.b32.xlu0 %v1759_v42, %s3662_s22 }
 0x1c6   :  { %1899 = vrot.lane.b32.xlu1 %v1762_v44, %s3660_s21 }
 0x1c7   :  { %1918 = vrot.lane.b32.xlu0 %v1761_v45, %s3662_s22 }
 0x1ca   :  { %1916 = vrot.lane.b32.xlu1 %v1760_v43, %s3662_s22 }
 0x1cb   :  { %1940 = vperm.xlu0 %3623, %v1937_v47  }
 0x1ce   :  { %1920 = vrot.lane.b32.xlu1 %v1762_v44, %s3662_s22 }
 0x200   :  { %v1771_v48 = vpop.permute.xlu1 %1770 }
 0x201   :  { %v1773_v49 = vpop.permute.xlu0 %1772 }
 0x202   :  { %v1776_v50 = vsel %vm231_vm1, %v1771_v48, %v1773_v49 }
 0x203   :  { %v1785_v51 = vmul.f32 %v1776_v50, %v3787_v20 }
 0x204   :  { %v1775_v52 = vpop.permute.xlu1 %1774 }
 0x205   :  { %v1789_v1 = vpop.permute.xlu0 %1788  ;;  %2092 = vmatprep.subr.mxu0 %v1785_v51  ;;  %v1777_v2 = vsel %vm231_vm1, %v1773_v49, %v1775_v52 }
 0x206   :  { %v1786_v20 = vmul.f32 %v1777_v2, %v3778_v17 }
 0x208   :  { %v1765_v3 = vpop.permute.xlu1 %1764 }
 0x209   :  { %v1778_v11 = vsel %vm231_vm1, %v1775_v52, %v1765_v3  ;;  %v1783_v5 = vsel %vm231_vm1, %v1765_v3, %v1771_v48  ;;  %v1794_v13 = vpop.permute.xlu0 %1793 }
 0x20a   :  { %v1784_v10 = vmul.f32 %v1783_v5, %v3784_v19  ;;  %v1787_v6 = vmul.f32 %v1778_v11, %v3781_v18 }
 0x20c   :  { %2163 = vmatprep.subr.mxu1 %v1787_v6  ;;  %v1792_v7 = vpop.permute.xlu1 %1791  ;;  %2093 = vmatpush1.msra.mxu0 %v1784_v10 }
 0x20d   :  { %v1797_v16 = vsel %vm253_vm2, %v1792_v7, %v1794_v13  ;;  %v1804_v21 = vsel %vm253_vm2, %v1789_v1, %v1792_v7  ;;  %2164 = vmatpush1.msra.mxu1 %v1786_v20  ;;  %v1810_v22 = vpop.permute.xlu0 %1809  ;;  %3514 = vmatmul.mubr.msk.f32.vlgmr.msra.gmra.mrb[2].mxu0 %vm406_vm0, %v2088_v12 }
 0x20e   :  { %v1805_v19 = vmul.f32 %v1804_v21, %v3815_v38  ;;  %v1806_v18 = vmul.f32 %v1797_v16, %v3809_v36  ;;  %3515 = vmatmul.mubr.msk.f32.vlgmr.msra.gmra.mrb[2].mxu1 %vm406_vm0, %v2088_v12  ;;  %2307 = vmatprep.mubr.f32.mxu0 %v3654_v4  ;;  %v3516_v36 = vld [vmem:[%s4213_s4 + $0x8] sm:$0xff] }
 0x20f   :  { %2378 = vmatprep.mubr.f32.mxu1 %v3654_v4 }
 0x210   :  { %v1796_v17 = vpop.permute.xlu1 %1795  ;;  %2243 = vmatprep.subr.mxu0 %v1806_v18 }
 0x211   :  { %v1798_v23 = vsel %vm253_vm2, %v1794_v13, %v1796_v17  ;;  %v1799_v24 = vsel %vm253_vm2, %v1796_v17, %v1789_v1  ;;  %v1815_v25 = vpop.permute.xlu0 %1814  ;;  %2244 = vmatpush1.msra.mxu0 %v1805_v19 }
 0x212   :  { %v1807_v26 = vmul.f32 %v1798_v23, %v3812_v37  ;;  %v1808_v38 = vmul.f32 %v1799_v24, %v3806_v35 }
 0x214   :  { %v1813_v31 = vpop.permute.xlu1 %1812  ;;  %2314 = vmatprep.subr.mxu1 %v1808_v38 }
 0x215   :  { %v1818_v32 = vsel %vm275_vm3, %v1813_v31, %v1815_v25  ;;  %v1825_v33 = vsel %vm275_vm3, %v1810_v22, %v1813_v31  ;;  %2315 = vmatpush1.msra.mxu1 %v1807_v26  ;;  %v1831_v42 = vpop.permute.xlu0 %1830  ;;  %3517 = vmatmul.mubr.msk.f32.vlgmr.msra.gmra.mrb[2].mxu0 %vm406_vm0, %v3516_v36 }
 0x216   :  { %v1826_v43 = vmul.f32 %v1825_v33, %v3845_v56  ;;  %v1827_v37 = vmul.f32 %v1818_v32, %v3839_v54  ;;  %3518 = vmatmul.mubr.msk.f32.vlgmr.msra.gmra.mrb[2].mxu1 %vm406_vm0, %v3516_v36  ;;  %2458 = vmatprep.mubr.f32.mxu0 %v3654_v4  ;;  %v3519_v54 = vld [vmem:[%s4213_s4 + $0x10] sm:$0xff] }
 0x217   :  { %2529 = vmatprep.mubr.f32.mxu1 %v3654_v4 }
 0x218   :  { %v1817_v35 = vpop.permute.xlu1 %1816  ;;  %2394 = vmatprep.subr.mxu0 %v1827_v37 }
 0x219   :  { %v1819_v44 = vsel %vm275_vm3, %v1815_v25, %v1817_v35  ;;  %v1820_v45 = vsel %vm275_vm3, %v1817_v35, %v1810_v22  ;;  %v1836_v46 = vpop.permute.xlu0 %1835  ;;  %2395 = vmatpush1.msra.mxu0 %v1826_v43 }
 0x21a   :  { %v1828_v47 = vmul.f32 %v1819_v44, %v3842_v55  ;;  %v1829_v56 = vmul.f32 %v1820_v45, %v3836_v53 }
 0x21c   :  { %v1834_v48 = vpop.permute.xlu1 %1833  ;;  %2465 = vmatprep.subr.mxu1 %v1829_v56 }
 0x21d   :  { %v1839_v49 = vsel %vm297_vm4, %v1834_v48, %v1836_v46  ;;  %v1846_v50 = vsel %vm297_vm4, %v1831_v42, %v1834_v48  ;;  %2466 = vmatpush1.msra.mxu1 %v1828_v47  ;;  %v1852_v51 = vpop.permute.xlu0 %1851  ;;  %3520 = vmatmul.mubr.msk.f32.vlgmr.msra.gmra.mrb[2].mxu0 %vm406_vm0, %v3519_v54 }
 0x21e   :  { %v1847_v52 = vmul.f32 %v1846_v50, %v3875_v15  ;;  %v1848_v55 = vmul.f32 %v1839_v49, %v3869_v9  ;;  %3521 = vmatmul.mubr.msk.f32.vlgmr.msra.gmra.mrb[2].mxu1 %vm406_vm0, %v3519_v54  ;;  %2609 = vmatprep.mubr.f32.mxu0 %v3654_v4  ;;  %v3522_v9 = vld [vmem:[%s4213_s4 + $0x18] sm:$0xff] }
 0x21f   :  { %2680 = vmatprep.mubr.f32.mxu1 %v3654_v4 }
 0x220   :  { %v1838_v53 = vpop.permute.xlu1 %1837  ;;  %2545 = vmatprep.subr.mxu0 %v1848_v55 }
 0x221   :  { %v1840_v1 = vsel %vm297_vm4, %v1836_v46, %v1838_v53  ;;  %v1841_v2 = vsel %vm297_vm4, %v1838_v53, %v1831_v42  ;;  %v1856_v3 = vpop.permute.xlu0 %1855  ;;  %2546 = vmatpush1.msra.mxu0 %v1847_v52 }
 0x222   :  { %v1849_v11 = vmul.f32 %v1840_v1, %v3872_v14  ;;  %v1850_v15 = vmul.f32 %v1841_v2, %v3866_v8 }
 0x224   :  { %v1854_v5 = vpop.permute.xlu1 %1853  ;;  %2616 = vmatprep.subr.mxu1 %v1850_v15 }
 0x225   :  { %v1859_v13 = vsel %vm318_vm5, %v1852_v51, %v1854_v5  ;;  %v1860_v10 = vsel %vm318_vm5, %v1854_v5, %v1856_v3  ;;  %2617 = vmatpush1.msra.mxu1 %v1849_v11  ;;  %v1873_v6 = vpop.permute.xlu0 %1872  ;;  %3523 = vmatmul.mubr.msk.f32.vlgmr.msra.gmra.mrb[2].mxu0 %vm406_vm0, %v3522_v9 }
 0x226   :  { %v1868_v12 = vmul.f32 %v1859_v13, %v3905_v41  ;;  %v1869_v14 = vmul.f32 %v1860_v10, %v3899_v39  ;;  %3524 = vmatmul.mubr.msk.f32.vlgmr.msra.gmra.mrb[2].mxu1 %vm406_vm0, %v3522_v9  ;;  %2760 = vmatprep.mubr.f32.mxu0 %v3654_v4  ;;  %v3525_v39 = vld [vmem:[%s4213_s4 + $0x28] sm:$0xff] }
 0x227   :  { %2831 = vmatprep.mubr.f32.mxu1 %v3654_v4 }
 0x228   :  { %v1858_v8 = vpop.permute.xlu1 %1857  ;;  %2696 = vmatprep.subr.mxu0 %v1869_v14 }
 0x229   :  { %v1861_v20 = vsel %vm318_vm5, %v1856_v3, %v1858_v8  ;;  %v1867_v7 = vsel %vm318_vm5, %v1858_v8, %v1852_v51  ;;  %v1877_v16 = vpop.permute.xlu0 %1876  ;;  %2697 = vmatpush1.msra.mxu0 %v1868_v12 }
 0x22a   :  { %v1870_v21 = vmul.f32 %v1861_v20, %v3902_v40  ;;  %v1871_v41 = vmul.f32 %v1867_v7, %v3896_v34 }
 0x22c   :  { %v1875_v22 = vpop.permute.xlu1 %1874  ;;  %2767 = vmatprep.subr.mxu1 %v1871_v41 }
 0x22d   :  { %v1880_v19 = vsel %vm340_vm6, %v1873_v6, %v1875_v22  ;;  %v1881_v18 = vsel %vm340_vm6, %v1875_v22, %v1877_v16  ;;  %2768 = vmatpush1.msra.mxu1 %v1870_v21  ;;  %v1894_v17 = vpop.permute.xlu0 %1893  ;;  %3526 = vmatmul.mubr.msk.f32.vlgmr.msra.gmra.mrb[2].mxu0 %vm406_vm0, %v3525_v39 }
 0x22e   :  { %v1889_v23 = vmul.f32 %v1880_v19, %v3935_v63  ;;  %v1890_v40 = vmul.f32 %v1881_v18, %v3929_v61  ;;  %3527 = vmatmul.mubr.msk.f32.vlgmr.msra.gmra.mrb[2].mxu1 %vm406_vm0, %v3525_v39  ;;  %2911 = vmatprep.mubr.f32.mxu0 %v3654_v4  ;;  %v3528_v61 = vld [vmem:[%s4213_s4 + $0x30] sm:$0xff]  ;;  %v3627_v19 = vld [vmem:[%s4209_s0 + $0x8] sm:$0xff] }
 0x22f   :  { %2982 = vmatprep.mubr.f32.mxu1 %v3654_v4  ;;  %v3626_v39 = vld [vmem:[%s4209_s0 + $0x10] sm:$0xff] }
 0x230   :  { %v1879_v34 = vpop.permute.xlu1 %1878  ;;  %2847 = vmatprep.subr.mxu0 %v1890_v40 }
 0x231   :  { %v1882_v24 = vsel %vm340_vm6, %v1877_v16, %v1879_v34  ;;  %v1888_v25 = vsel %vm340_vm6, %v1879_v34, %v1873_v6  ;;  %v1898_v26 = vpop.permute.xlu0 %1897  ;;  %2848 = vmatpush1.msra.mxu0 %v1889_v23  ;;  %v3625_v16 = vld [vmem:[%s4209_s0] sm:$0xff] }
 0x232   :  { %v1891_v38 = vmul.f32 %v1882_v24, %v3932_v62  ;;  %v1892_v63 = vmul.f32 %v1888_v25, %v3926_v60 }
 0x234   :  { %v1896_v36 = vpop.permute.xlu1 %1895  ;;  %2918 = vmatprep.subr.mxu1 %v1892_v63 }
 0x235   :  { %v1901_v31 = vsel %vm362_vm7, %v1894_v17, %v1896_v36  ;;  %v1902_v32 = vsel %vm362_vm7, %v1896_v36, %v1898_v26  ;;  %2919 = vmatpush1.msra.mxu1 %v1891_v38  ;;  %3529 = vmatmul.mubr.msk.f32.vlgmr.msra.gmra.mrb[2].mxu0 %vm406_vm0, %v3528_v61  ;;  %v1915_v62 = vpop.permute.xlu0 %1914 }
 0x236   :  { %v1910_v33 = vmul.f32 %v1901_v31, %v3965_v30  ;;  %v1911_v42 = vmul.f32 %v1902_v32, %v3959_v28  ;;  %3530 = vmatmul.mubr.msk.f32.vlgmr.msra.gmra.mrb[2].mxu1 %vm406_vm0, %v3528_v61  ;;  %3062 = vmatprep.mubr.f32.mxu0 %v3654_v4  ;;  %v3531_v28 = vld [vmem:[%s4213_s4 + $0x38] sm:$0xff] }
 0x237   :  { %3133 = vmatprep.mubr.f32.mxu1 %v3654_v4 }
 0x238   :  { %v1900_v60 = vpop.permute.xlu1 %1899  ;;  %2998 = vmatprep.subr.mxu0 %v1911_v42 }
 0x239   :  { %v1903_v43 = vsel %vm362_vm7, %v1898_v26, %v1900_v60  ;;  %v1909_v37 = vsel %vm362_vm7, %v1900_v60, %v1894_v17  ;;  %2999 = vmatpush1.msra.mxu0 %v1910_v33  ;;  %v1919_v44 = vpop.permute.xlu0 %1918  ;;  %v3628_v17 = vld [vmem:[%s4209_s0 + $0x18] sm:$0xff] }
 0x23a   :  { %v1912_v35 = vmul.f32 %v1903_v43, %v3962_v29  ;;  %v1913_v30 = vmul.f32 %v1909_v37, %v3956_v27 }
 0x23c   :  { %v1917_v45 = vpop.permute.xlu1 %1916  ;;  %3069 = vmatprep.subr.mxu1 %v1913_v30 }
 0x23d   :  { %v1922_v46 = vsel %vm384_vm8, %v1915_v62, %v1917_v45  ;;  %v1923_v47 = vsel %vm384_vm8, %v1917_v45, %v1919_v44  ;;  %3532 = vmatmul.mubr.msk.f32.vlgmr.msra.gmra.mrb[2].mxu0 %vm406_vm0, %v3531_v28  ;;  %3070 = vmatpush1.msra.mxu1 %v1912_v35 }
 0x23e   :  { %v1931_v56 = vmul.f32 %v1922_v46, %v3995_v0  ;;  %v1932_v29 = vmul.f32 %v1923_v47, %v3989_v58  ;;  %3533 = vmatmul.mubr.msk.f32.vlgmr.msra.gmra.mrb[2].mxu1 %vm406_vm0, %v3531_v28  ;;  %3213 = vmatprep.mubr.f32.mxu0 %v3654_v4  ;;  %v3534_v58 = vld [vmem:[%s4213_s4 + $0x40] sm:$0xff] }
 0x23f   :  { %3284 = vmatprep.mubr.f32.mxu1 %v3654_v4 }
 0x240   :  { %v1921_v27 = vpop.permute.xlu1 %1920  ;;  %3149 = vmatprep.subr.mxu0 %v1932_v29 }
 0x241   :  { %v1924_v54 = vsel %vm384_vm8, %v1919_v44, %v1921_v27  ;;  %v1930_v48 = vsel %vm384_vm8, %v1921_v27, %v1915_v62  ;;  %3150 = vmatpush1.msra.mxu0 %v1931_v56 }
 0x242   :  { %v1933_v49 = vmul.f32 %v1924_v54, %v3992_v59  ;;  %v1934_v50 = vmul.f32 %v1930_v48, %v3986_v57  ;;  %v3300_v59 = vld [vmem:[%s4216_s7] sm:$0xff]  ;;  %s3663_s7 = smov [#allocation2]  }
 0x243   :  { %3303 = vperm.xlu1 %3624, %v3300_v59   ;;  %s3465_s1 = sshll.u32 %s3663_s7, 4  ;;  %s3466_s1 = int_to_ptr.vmem [resolvable:$true] %s3465_s1 }
 0x244   :  { %3220 = vmatprep.subr.mxu1 %v1934_v50  ;;  %s3629_s19 = scalar_lea.vmem %s3466_s1, 512  ;;  %p3634_p1 = scmp.lt.s32.totalorder %s3466_s1, %s3466_s1 }
 0x245   :  { %3535 = vmatmul.mubr.msk.f32.vlgmr.msra.gmra.mrb[2].mxu0 %vm406_vm0, %v3534_v58  ;;  %3221 = vmatpush1.msra.mxu1 %v1933_v49  ;;  %p3630_p0 = scmp.ne.s32.totalorder %s3466_s1, %s3629_s19  ;;  %p3635_p2 = scmp.lt.s32.totalorder %s3629_s19, %s3629_s19 }
 0x246   :  { %3536 = vmatmul.mubr.msk.f32.vlgmr.msra.gmra.mrb[2].mxu1 %vm406_vm0, %v3534_v58  ;;  %3373 = vmatprep.mubr.f32.mxu0 %v3654_v4 }
 0x247   :  { %3444 = vmatprep.mubr.f32.mxu1 %v3654_v4  ;;  %v3299_v4 = vld [vmem:[%s4215_s6] sm:$0xff]  ;;  %p3636_p3 = por %p3635_p2, %p3634_p1 }
 0x249   :  { %p3637_p4 = pnand %p3636_p3, %p3630_p0 }
 0x24a   :  { %v1941_v57 = vpop.permute.xlu0 %1940 }
 0x2c2   :  { %v3304_v13 = vpop.permute.xlu1 %3303 }
 0x318   :  { %v3215_v0 = vpop.f32.mrb[2].mxu0 }
 0x319   :  { %v3543_v51 = vadd.f32 %v3215_v0, %v1941_v57  ;;  %v3217_v52 = vpop.f32.mrb[3].mxu0  ;;  %v3286_v55 = vpop.f32.mrb[2].mxu1 }
 0x31a   :  { %v3544_v53 = vadd.f32 %v3217_v52, %v1941_v57  ;;  %v3545_v1 = vadd.f32 %v3286_v55, %v1941_v57  ;;  %v3288_v2 = vpop.f32.mrb[3].mxu1 }
 0x31b   :  { %v3546_v3 = vadd.f32 %v3288_v2, %v1941_v57  ;;  %v3295_v15 = vmax.f32 %v3543_v51, 0.0 }
 0x31c   :  { %v3296_v11 = vmax.f32 %v3544_v53, 0.0  ;;  %v3297_v5 = vmax.f32 %v3545_v1, 0.0 }
 0x31d   :  { %v3298_v9 = vmax.f32 %v3546_v3, 0.0 }
 0x31e   :  { %3309 = vmatprep.subr.mxu0 %v3296_v11 }
 0x31f   :  { %3310 = vmatpush1.msra.mxu0 %v3295_v15  ;;  %3380 = vmatprep.subr.mxu1 %v3298_v9 }
 0x320   :  { %3381 = vmatpush1.msra.mxu1 %v3297_v5  ;;  %3537 = vmatmul.mubr.msk.f32.vlgmr.msra.gmra.mrb[4].mxu0 %vm406_vm0, %v3299_v4 }
 0x321   :  { %3538 = vmatmul.mubr.msk.f32.vlgmr.msra.gmra.mrb[4].mxu1 %vm406_vm0, %v3299_v4 }
 0x3f3   :  { %v3375_v10 = vpop.f32.mrb[4].mxu0 }
 0x3f4   :  { %v3446_v6 = vpop.f32.mrb[4].mxu1  ;;  %v3376_v12 = vadd.f32 %v3375_v10, %v3304_v13  ;;  %v3377_v14 = vpop.f32.mrb[5].mxu0 }
 0x3f5   :  { %v3447_v8 = vadd.f32 %v3446_v6, %v3304_v13  ;;  %v3378_v20 = vadd.f32 %v3377_v14, %v3304_v13  ;;  %v3448_v7 = vpop.f32.mrb[5].mxu1 }
 0x3f6   :  { %v3451_v21 = vadd.f32 %v3625_v16, %v3376_v12  ;;  %v3449_v41 = vadd.f32 %v3448_v7, %v3304_v13 }
 0x3f7   :  { %v3453_v22 = vadd.f32 %v3626_v39, %v3447_v8  ;;  %v3452_v18 = vadd.f32 %v3627_v19, %v3378_v20 }
 0x3f8   :  { %3455 = vst [vmem:[#allocation2] sm:$0xff] %v3451_v21  ;;  %v3454_v23 = vadd.f32 %v3628_v17, %v3449_v41 }
 0x3f9   :  { %3458 = vst [vmem:[#allocation2 + $0x10] sm:$0xff] %v3453_v22  ;;  %3456 = vst [vmem:[#allocation2 + $0x8] sm:$0xff] %v3452_v18 }
 0x3fa   :  { %3459 = vst [vmem:[#allocation2 + $0x18] sm:$0xff] %v3454_v23 }
 0x3fb   :  { %3640 = shalt.err (!%p3637_p4)
}
 0x3fc   :  { %s3641_s22 = scalar_lea.hbm %s4217_s8, 512 }
 0x3fd   :  { %p3642_p5 = scmp.ne.s32.totalorder %s4217_s8, %s3641_s22  ;;  %p3645_p6 = scmp.lt.u32.totalorder %s3641_s22, %s4217_s8 }
 0x3ff   :  { %p3647_p7 = pnand %p3645_p6, %p3642_p5 }
 0x401   :  { %3650 = shalt.err (!%p3647_p7)
}
 0x402   :  { %s3664_s29 = smov 256  }
 0x403   :  { %3471 = dma.vmem_to_hbm [thread:$0]  %s3466_s1, 512, %s4217_s8, [#allocation3], %s3664_s29, %s3664_s29, %s3655_s16  }
 0x404   :  { %3651 = dma.done.wait [#allocation3], 512  }
 0x405   :  { %3652 = vsyncadd [#allocation3], 4294966784 }
 0x406   :  { %3475 = vsyncpa [#allocation3], 1 }

</bundles_post_ra>
